<compile_context>
chip_gen: v7x
topology: tpu7x:2x2x1
jax: 0.10.0
libtpu: 0.0.40
codegen_flags: <defaults>
</compile_context>

<pallas_src>
import functools

import jax
import jax.numpy as jnp
from jax import lax
from jax.experimental import pallas as pl
from jax.experimental.pallas import tpu as pltpu


def _round_up(x, m):
    return ((x + m - 1) // m) * m


def residual_block_kernel(*refs, kernel_size, dilation, tl, cp, pad, h8,
                          compute_dtype):
    """One (batch, time-tile) grid step — stateless across steps.

    refs (pad > 0):
      x_ref    : (1, TL, Cp)       current time tile (compute dtype)
      halo_ref : (1, 1, H8, Cp)    causal halo rows preceding this tile
      w12_ref  : (K, Cp, 2*Cp)     fused conv1|conv2 weights, tap-major
      b12_ref  : (1, 2*Cp)         fused biases (f32)
      wsk_ref  : (Cp, Cp)          1x1 skip conv as a matmul
      bsk_ref  : (1, Cp)           skip bias (f32)
      out_ref  : (1, TL, Cp)
      skip_ref : (1, TL, Cp)
      xbuf_ref : (H8 + TL, Cp)     scratch: [halo | tile] assembly buffer
    refs (pad == 0): same without halo_ref / xbuf_ref.
    """
    if pad > 0:
        (x_ref, halo_ref, w12_ref, b12_ref, wsk_ref, bsk_ref,
         out_ref, skip_ref, xbuf_ref) = refs
    else:
        (x_ref, w12_ref, b12_ref, wsk_ref, bsk_ref, out_ref, skip_ref) = refs

    x_tile = x_ref[0]                                    # (TL, Cp)

    if pad > 0:
        # Assemble [halo | tile] in VMEM so every tap is one contiguous
        # (TL, Cp) window.  Both stores are sublane-aligned (h8 % 8 == 0).
        xbuf_ref[pl.ds(0, h8), :] = halo_ref[0, 0]
        xbuf_ref[pl.ds(h8, tl), :] = x_tile

    off = h8 - pad                                       # static python int

    # The last tap reads exactly the fresh tile -> start the accumulation
    # there so all K dots chain as MXU accumulation; bias is added afterwards.
    acc = jnp.dot(x_tile, w12_ref[kernel_size - 1],
                  preferred_element_type=jnp.float32)
    for k in range(kernel_size - 1):                     # static, small K
        xk = xbuf_ref[pl.ds(off + k * dilation, tl), :]
        acc = acc + jnp.dot(xk, w12_ref[k], preferred_element_type=jnp.float32)
    acc = acc + b12_ref[...]                             # (1, 2Cp) broadcast

    # GLU over the channel dim (the torch.cat was along dim=1).
    gated = acc[:, :cp] * jax.nn.sigmoid(acc[:, cp:])

    # 1x1 skip conv.
    skip = jnp.dot(gated.astype(compute_dtype), wsk_ref[...],
                   preferred_element_type=jnp.float32) + bsk_ref[...]

    # Residual add.
    out_ref[0] = (gated + x_tile.astype(jnp.float32)).astype(out_ref.dtype)
    skip_ref[0] = skip.astype(skip_ref.dtype)


def residual_block_nlc(x_nlc, w1, b1, w2, b2, wskip, bskip, *,
                       kernel_size, dilation, time_tile=4096,
                       compute_dtype=jnp.bfloat16, out_dtype=None):
    """Channel-last core: x_nlc (N, L, C); weights in PyTorch (Cout, Cin, K)."""
    N, L, C = x_nlc.shape
    K = kernel_size
    pad = (K - 1) * dilation
    h8 = _round_up(pad, 8) if pad > 0 else 0
    if out_dtype is None:
        out_dtype = compute_dtype

    Cp = _round_up(max(C, 128), 128)                     # lane-dense channels
    TL = min(_round_up(time_tile, 8), _round_up(L, 8))

    in_b = jnp.dtype(compute_dtype).itemsize
    out_b = jnp.dtype(out_dtype).itemsize
    w_bytes = (K * Cp * 2 * Cp + Cp * Cp) * in_b + 3 * Cp * 4

    def _footprint(tl_):
        per_step = tl_ * Cp * in_b + (h8 * Cp * in_b if pad > 0 else 0) \
                   + 2 * tl_ * Cp * out_b
        scratch = (h8 + tl_) * Cp * in_b if pad > 0 else 0
        # x / halo / outputs / weights double-buffered by the pipeliner.
        return 2 * (per_step + w_bytes) + scratch

    VMEM_BUDGET = 36 * 1024 * 1024                       # safe on v7x (64 MiB phys)
    while _footprint(TL) > VMEM_BUDGET and TL > 512:
        TL = max(512, _round_up(TL // 2, 8))

    Lt = _round_up(L, TL)
    T = Lt // TL

    # Zero-pad channels to Cp (full-lane vst) and time (right side) to Lt.
    x_p = jnp.pad(x_nlc, ((0, 0), (0, Lt - L), (0, Cp - C))).astype(compute_dtype)

    operands = [x_p]
    if pad > 0:
        # Per-tile causal halo read from HBM (instead of a scratch carry), so
        # there is no cross-step state and both grid axes stay parallel.
        # Extra HBM bytes: ~pad/TL of the input — negligible.
        zeros_head = jnp.zeros((N, 1, h8, Cp), compute_dtype)
        if T == 1:
            x_halo = zeros_head
        elif h8 <= TL:
            tails = x_p[:, :(T - 1) * TL, :].reshape(N, T - 1, TL, Cp)[:, :, TL - h8:, :]
            x_halo = jnp.concatenate([zeros_head, tails], axis=1)
        else:
            # Halo wider than one tile (very large dilation): gather from a
            # left-padded copy.  Rare; correctness over wrapper traffic.
            x_lp = jnp.pad(x_p, ((0, 0), (h8, 0), (0, 0)))
            idx = jnp.arange(T)[:, None] * TL + jnp.arange(h8)[None, :]
            x_halo = x_lp[:, idx, :]
        operands.append(x_halo)

    # PyTorch (Cout, Cin, K) -> (K, Cin, Cout), channel-pad, fuse conv1|conv2.
    def prep_w(w):
        wk = jnp.transpose(w, (2, 1, 0))
        return jnp.pad(wk, ((0, 0), (0, Cp - C), (0, Cp - C)))

    w12 = jnp.concatenate([prep_w(w1), prep_w(w2)], axis=-1).astype(compute_dtype)
    b12 = jnp.concatenate(
        [jnp.pad(b1, (0, Cp - C)), jnp.pad(b2, (0, Cp - C))]
    ).reshape(1, 2 * Cp).astype(jnp.float32)
    wsk = jnp.pad(wskip[:, :, 0].T, ((0, Cp - C), (0, Cp - C))).astype(compute_dtype)
    bsk = jnp.pad(bskip, (0, Cp - C)).reshape(1, Cp).astype(jnp.float32)
    operands += [w12, b12, wsk, bsk]

    in_specs = [pl.BlockSpec((1, TL, Cp), lambda n, t: (n, t, 0))]
    if pad > 0:
        in_specs.append(pl.BlockSpec((1, 1, h8, Cp), lambda n, t: (n, t, 0, 0)))
    in_specs += [
        pl.BlockSpec((K, Cp, 2 * Cp), lambda n, t: (0, 0, 0)),  # fused conv w
        pl.BlockSpec((1, 2 * Cp), lambda n, t: (0, 0)),         # fused bias
        pl.BlockSpec((Cp, Cp), lambda n, t: (0, 0)),            # skip w
        pl.BlockSpec((1, Cp), lambda n, t: (0, 0)),             # skip b
    ]
    scratch_shapes = [pltpu.VMEM((h8 + TL, Cp), compute_dtype)] if pad > 0 else []

    kernel = functools.partial(
        residual_block_kernel, kernel_size=K, dilation=dilation,
        tl=TL, cp=Cp, pad=pad, h8=h8, compute_dtype=compute_dtype)

    vmem_limit = int(max(32 * 1024 * 1024, _footprint(TL) + (8 << 20)))

    out_nlc, skip_nlc = pl.pallas_call(
        kernel,
        out_shape=(jax.ShapeDtypeStruct((N, Lt, Cp), out_dtype),
                   jax.ShapeDtypeStruct((N, Lt, Cp), out_dtype)),
        grid_spec=pltpu.PrefetchScalarGridSpec(
            num_scalar_prefetch=0,
            grid=(N, T),
            in_specs=in_specs,
            out_specs=[pl.BlockSpec((1, TL, Cp), lambda n, t: (n, t, 0)),
                       pl.BlockSpec((1, TL, Cp), lambda n, t: (n, t, 0))],
            scratch_shapes=scratch_shapes),
        compiler_params=pltpu.CompilerParams(
            dimension_semantics=("parallel", "parallel"),
            vmem_limit_bytes=vmem_limit),
    )(*operands)

    # NOTE: rows [L, Lt) of the padded outputs hold bias/GLU values (not zeros);
    # they are stripped here and must not be consumed directly.
    return out_nlc[:, :L, :C], skip_nlc[:, :L, :C]


def residual_block(x_ncl, w1, b1, w2, b2, wskip, bskip, **kw):
    """PyTorch-layout wrapper: x_ncl (N, C, L) -> (out, skip) both (N, C, L).

    If the surrounding model keeps activations channel-last, call
    `residual_block_nlc` directly and skip these transposes (they are pure HBM
    traffic).  Under jit the input transpose/pad/cast fuse into one XLA pass.
    """
    out, skip = residual_block_nlc(jnp.transpose(x_ncl, (0, 2, 1)),
                                   w1, b1, w2, b2, wskip, bskip, **kw)
    return jnp.transpose(out, (0, 2, 1)), jnp.transpose(skip, (0, 2, 1))


def reference_forward(x_ncl, w1, b1, w2, b2, wskip, bskip, *, kernel_size, dilation):
    """Pure-JAX/XLA reference matching the PyTorch semantics (NCL layout)."""
    pad = (kernel_size - 1) * dilation
    dn = ("NCH", "OIH", "NCH")

    def causal_conv(x, w, b):
        y = lax.conv_general_dilated(
            x, w, window_strides=(1,), padding=[(pad, 0)],
            rhs_dilation=(dilation,), dimension_numbers=dn)
        return y + b[None, :, None]

    x1 = causal_conv(x_ncl, w1, b1)
    x2 = causal_conv(x_ncl, w2, b2)
    gated = x1 * jax.nn.sigmoid(x2)
    skip = lax.conv_general_dilated(
        gated, wskip, window_strides=(1,), padding=[(0, 0)],
        dimension_numbers=dn) + bskip[None, :, None]
    out = gated + x_ncl
    return out, skip


if __name__ == "__main__":
    N, C, L = 2, 16, 200
    kernel_size, dilation = 3, 2

    key = jax.random.PRNGKey(0)
    kx, k1w, k1b, k2w, k2b, ksw, ksb = jax.random.split(key, 7)

    x = jax.random.normal(kx, (N, C, L), dtype=jnp.float32)
    # PyTorch Conv1d parameter shapes: weight (Cout, Cin, K), bias (Cout,)
    w1 = 0.1 * jax.random.normal(k1w, (C, C, kernel_size), dtype=jnp.float32)
    b1 = 0.1 * jax.random.normal(k1b, (C,), dtype=jnp.float32)
    w2 = 0.1 * jax.random.normal(k2w, (C, C, kernel_size), dtype=jnp.float32)
    b2 = 0.1 * jax.random.normal(k2b, (C,), dtype=jnp.float32)
    wskip = 0.1 * jax.random.normal(ksw, (C, C, 1), dtype=jnp.float32)
    bskip = 0.1 * jax.random.normal(ksb, (C,), dtype=jnp.float32)

    out_ref_, skip_ref_ = reference_forward(
        x, w1, b1, w2, b2, wskip, bskip,
        kernel_size=kernel_size, dilation=dilation)

    # 1) f32 path, small time_tile -> multiple time tiles, exercises the
    #    per-tile HBM halo (tails branch) and the ragged right pad.
    run_f32 = jax.jit(functools.partial(
        residual_block, kernel_size=kernel_size, dilation=dilation,
        time_tile=128, compute_dtype=jnp.float32))
    out32, skip32 = run_f32(x, w1, b1, w2, b2, wskip, bskip)
    out32 = jax.block_until_ready(out32)
    skip32 = jax.block_until_ready(skip32)
    assert out32.shape == (N, C, L) and skip32.shape == (N, C, L)
    assert jnp.allclose(out32, out_ref_, atol=1e-4, rtol=1e-4)
    assert jnp.allclose(skip32, skip_ref_, atol=1e-4, rtol=1e-4)

    # 2) default fast path: bf16 compute, bf16 outputs, default (large) time
    #    tile -> single time tile (zero halo branch); looser tolerance.
    run_bf16 = jax.jit(functools.partial(
        residual_block, kernel_size=kernel_size, dilation=dilation))
    out16, skip16 = run_bf16(x, w1, b1, w2, b2, wskip, bskip)
    out16 = jax.block_until_ready(out16)
    skip16 = jax.block_until_ready(skip16)
    assert out16.shape == (N, C, L) and skip16.shape == (N, C, L)
    assert jnp.allclose(out16, out_ref_, atol=5e-2, rtol=5e-2)
    assert jnp.allclose(skip16, skip_ref_, atol=5e-2, rtol=5e-2)

    # 3) very large dilation (halo wider than the time tile) -> gather branch.
    dil_big = 64
    out_ref_b, skip_ref_b = reference_forward(
        x, w1, b1, w2, b2, wskip, bskip,
        kernel_size=kernel_size, dilation=dil_big)
    run_big = jax.jit(functools.partial(
        residual_block, kernel_size=kernel_size, dilation=dil_big,
        time_tile=64, compute_dtype=jnp.float32))
    outb, skipb = run_big(x, w1, b1, w2, b2, wskip, bskip)
    outb = jax.block_until_ready(outb)
    skipb = jax.block_until_ready(skipb)
    assert jnp.allclose(outb, out_ref_b, atol=1e-4, rtol=1e-4)
    assert jnp.allclose(skipb, skip_ref_b, atol=1e-4, rtol=1e-4)

    print("KERNEL_OK")
</pallas_src>

<mosaic_0001>
module attributes {stable_mosaic.version = 11 : i64} {
  func.func @residual_block_kernel(%arg0: i32, %arg1: i32, %arg2: memref<1x128x128xf32, #tpu.memory_space<vmem>>, %arg3: memref<1x1x8x128xf32, #tpu.memory_space<vmem>>, %arg4: memref<3x128x256xf32, #tpu.memory_space<vmem>>, %arg5: memref<1x256xf32, #tpu.memory_space<vmem>>, %arg6: memref<128x128xf32, #tpu.memory_space<vmem>>, %arg7: memref<1x128xf32, #tpu.memory_space<vmem>>, %arg8: memref<1x128x128xf32, #tpu.memory_space<vmem>>, %arg9: memref<1x128x128xf32, #tpu.memory_space<vmem>>, %arg10: memref<136x128xf32, #tpu.memory_space<vmem>>) attributes {dimension_semantics = [#tpu.dimension_semantics<parallel>, #tpu.dimension_semantics<parallel>], iteration_bounds = array<i64: 2, 2>, scalar_prefetch = 0 : i64, scratch_operands = 1 : i64, tpu.core_type = #tpu.core_type<tc>, window_params = [{transform_indices = @transform_0, window_bounds = array<i64: 1, 128, 128>}, {transform_indices = @transform_1, window_bounds = array<i64: 1, 1, 8, 128>}, {pipeline_mode = #tpu.pipeline_mode<synchronous>, transform_indices = @transform_2, window_bounds = array<i64: 3, 128, 256>}, {pipeline_mode = #tpu.pipeline_mode<synchronous>, transform_indices = @transform_3, window_bounds = array<i64: 1, 256>}, {pipeline_mode = #tpu.pipeline_mode<synchronous>, transform_indices = @transform_4, window_bounds = array<i64: 128, 128>}, {pipeline_mode = #tpu.pipeline_mode<synchronous>, transform_indices = @transform_5, window_bounds = array<i64: 1, 128>}, {transform_indices = @transform_6, window_bounds = array<i64: 1, 128, 128>}, {transform_indices = @transform_7, window_bounds = array<i64: 1, 128, 128>}]} {
    %c0 = arith.constant 0 : index
    %c0_0 = arith.constant 0 : index
    %c0_1 = arith.constant 0 : index
    %0 = vector.load %arg2[%c0, %c0_0, %c0_1] : memref<1x128x128xf32, #tpu.memory_space<vmem>>, vector<1x128x128xf32>
    %1 = vector.shape_cast %0 : vector<1x128x128xf32> to vector<128x128xf32>
    %c0_2 = arith.constant 0 : index
    %c0_3 = arith.constant 0 : index
    %c0_4 = arith.constant 0 : index
    %c0_5 = arith.constant 0 : index
    %2 = vector.load %arg3[%c0_2, %c0_3, %c0_4, %c0_5] : memref<1x1x8x128xf32, #tpu.memory_space<vmem>>, vector<1x1x8x128xf32>
    %3 = vector.shape_cast %2 : vector<1x1x8x128xf32> to vector<8x128xf32>
    %c0_6 = arith.constant 0 : index
    %c0_7 = arith.constant 0 : index
    %4 = vector.load %arg10[%c0_6, %c0_7] : memref<136x128xf32, #tpu.memory_space<vmem>>, vector<8x128xf32>
    tpu.vector_store %arg10[%c0_6, %c0_7], %3 {strides = array<i32>} : memref<136x128xf32, #tpu.memory_space<vmem>>, vector<8x128xf32>,
    %c8 = arith.constant 8 : index
    %c0_8 = arith.constant 0 : index
    %5 = vector.load %arg10[%c8, %c0_8] : memref<136x128xf32, #tpu.memory_space<vmem>>, vector<128x128xf32>
    tpu.vector_store %arg10[%c8, %c0_8], %1 {strides = array<i32>} : memref<136x128xf32, #tpu.memory_space<vmem>>, vector<128x128xf32>,
    %c2 = arith.constant 2 : index
    %c0_9 = arith.constant 0 : index
    %c0_10 = arith.constant 0 : index
    %6 = vector.load %arg4[%c2, %c0_9, %c0_10] : memref<3x128x256xf32, #tpu.memory_space<vmem>>, vector<1x128x256xf32>
    %7 = vector.shape_cast %6 : vector<1x128x256xf32> to vector<128x256xf32>
    %cst = arith.constant dense<0.000000e+00> : vector<128x256xf32>
    %8 = tpu.matmul %1, %7, %cst {dimension_numbers = #tpu.dot_dimension_numbers<[1], [0], [0], [1], [0, 0, 1, 1], [], []>} : vector<128x128xf32>, vector<128x256xf32>, vector<128x256xf32> -> vector<128x256xf32>
    %c4 = arith.constant 4 : index
    %c0_11 = arith.constant 0 : index
    %9 = vector.load %arg10[%c4, %c0_11] : memref<136x128xf32, #tpu.memory_space<vmem>>, vector<128x128xf32>
    %c0_12 = arith.constant 0 : index
    %c0_13 = arith.constant 0 : index
    %c0_14 = arith.constant 0 : index
    %10 = vector.load %arg4[%c0_12, %c0_13, %c0_14] : memref<3x128x256xf32, #tpu.memory_space<vmem>>, vector<1x128x256xf32>
    %11 = vector.shape_cast %10 : vector<1x128x256xf32> to vector<128x256xf32>
    %cst_15 = arith.constant dense<0.000000e+00> : vector<128x256xf32>
    %12 = tpu.matmul %9, %11, %cst_15 {dimension_numbers = #tpu.dot_dimension_numbers<[1], [0], [0], [1], [0, 0, 1, 1], [], []>} : vector<128x128xf32>, vector<128x256xf32>, vector<128x256xf32> -> vector<128x256xf32>
    %13 = arith.addf %8, %12 : vector<128x256xf32>
    %c6 = arith.constant 6 : index
    %c0_16 = arith.constant 0 : index
    %14 = vector.load %arg10[%c6, %c0_16] : memref<136x128xf32, #tpu.memory_space<vmem>>, vector<128x128xf32>
    %c1 = arith.constant 1 : index
    %c0_17 = arith.constant 0 : index
    %c0_18 = arith.constant 0 : index
    %15 = vector.load %arg4[%c1, %c0_17, %c0_18] : memref<3x128x256xf32, #tpu.memory_space<vmem>>, vector<1x128x256xf32>
    %16 = vector.shape_cast %15 : vector<1x128x256xf32> to vector<128x256xf32>
    %cst_19 = arith.constant dense<0.000000e+00> : vector<128x256xf32>
    %17 = tpu.matmul %14, %16, %cst_19 {dimension_numbers = #tpu.dot_dimension_numbers<[1], [0], [0], [1], [0, 0, 1, 1], [], []>} : vector<128x128xf32>, vector<128x256xf32>, vector<128x256xf32> -> vector<128x256xf32>
    %18 = arith.addf %13, %17 : vector<128x256xf32>
    %c0_20 = arith.constant 0 : index
    %c0_21 = arith.constant 0 : index
    %19 = vector.load %arg5[%c0_20, %c0_21] : memref<1x256xf32, #tpu.memory_space<vmem>>, vector<1x256xf32>
    %20 = vector.broadcast %19 : vector<1x256xf32> to vector<128x256xf32>
    %21 = arith.addf %18, %20 : vector<128x256xf32>
    %22 = vector.extract_strided_slice %21 {offsets = [0, 0], sizes = [128, 128], strides = [1, 1]} : vector<128x256xf32> to vector<128x128xf32>
    %23 = vector.extract_strided_slice %21 {offsets = [0, 128], sizes = [128, 128], strides = [1, 1]} : vector<128x256xf32> to vector<128x128xf32>
    %24 = arith.negf %23 : vector<128x128xf32>
    %25 = math.exp %24 : vector<128x128xf32>
    %cst_22 = arith.constant 1.000000e+00 : f32
    %26 = vector.broadcast %cst_22 : f32 to vector<128x128xf32>
    %27 = arith.addf %26, %25 : vector<128x128xf32>
    %28 = arith.divf %26, %27 : vector<128x128xf32>
    %29 = arith.mulf %22, %28 : vector<128x128xf32>
    %c0_23 = arith.constant 0 : index
    %c0_24 = arith.constant 0 : index
    %30 = vector.load %arg6[%c0_23, %c0_24] : memref<128x128xf32, #tpu.memory_space<vmem>>, vector<128x128xf32>
    %cst_25 = arith.constant dense<0.000000e+00> : vector<128x128xf32>
    %31 = tpu.matmul %29, %30, %cst_25 {dimension_numbers = #tpu.dot_dimension_numbers<[1], [0], [0], [1], [0, 0, 1, 1], [], []>} : vector<128x128xf32>, vector<128x128xf32>, vector<128x128xf32> -> vector<128x128xf32>
    %c0_26 = arith.constant 0 : index
    %c0_27 = arith.constant 0 : index
    %32 = vector.load %arg7[%c0_26, %c0_27] : memref<1x128xf32, #tpu.memory_space<vmem>>, vector<1x128xf32>
    %33 = vector.broadcast %32 : vector<1x128xf32> to vector<128x128xf32>
    %34 = arith.addf %31, %33 : vector<128x128xf32>
    %35 = arith.addf %29, %1 : vector<128x128xf32>
    %c0_28 = arith.constant 0 : index
    %c0_29 = arith.constant 0 : index
    %c0_30 = arith.constant 0 : index
    %36 = vector.load %arg8[%c0_28, %c0_29, %c0_30] : memref<1x128x128xf32, #tpu.memory_space<vmem>>, vector<1x128x128xf32>
    %37 = vector.shape_cast %36 : vector<1x128x128xf32> to vector<128x128xf32>
    %38 = vector.shape_cast %35 : vector<128x128xf32> to vector<1x128x128xf32>
    tpu.vector_store %arg8[%c0_28, %c0_29, %c0_30], %38 {strides = array<i32>} : memref<1x128x128xf32, #tpu.memory_space<vmem>>, vector<1x128x128xf32>,
    %c0_31 = arith.constant 0 : index
    %c0_32 = arith.constant 0 : index
    %c0_33 = arith.constant 0 : index
    %39 = vector.load %arg9[%c0_31, %c0_32, %c0_33] : memref<1x128x128xf32, #tpu.memory_space<vmem>>, vector<1x128x128xf32>
    %40 = vector.shape_cast %39 : vector<1x128x128xf32> to vector<128x128xf32>
    %41 = vector.shape_cast %34 : vector<128x128xf32> to vector<1x128x128xf32>
    tpu.vector_store %arg9[%c0_31, %c0_32, %c0_33], %41 {strides = array<i32>} : memref<1x128x128xf32, #tpu.memory_space<vmem>>, vector<1x128x128xf32>,
    return
  }
  func.func @transform_0(%arg0: i32, %arg1: i32) -> (i32, i32, i32) {
    %c0_i32 = arith.constant 0 : i32
    %c0_i32_0 = arith.constant 0 : i32
    return %arg0, %arg1, %c0_i32 : i32, i32, i32
  }
  func.func @transform_1(%arg0: i32, %arg1: i32) -> (i32, i32, i32, i32) {
    %c0_i32 = arith.constant 0 : i32
    %c0_i32_0 = arith.constant 0 : i32
    %c0_i32_1 = arith.constant 0 : i32
    return %arg0, %arg1, %c0_i32, %c0_i32_0 : i32, i32, i32, i32
  }
  func.func @transform_2(%arg0: i32, %arg1: i32) -> (i32, i32, i32) {
    %c0_i32 = arith.constant 0 : i32
    %c0_i32_0 = arith.constant 0 : i32
    %c0_i32_1 = arith.constant 0 : i32
    %c0_i32_2 = arith.constant 0 : i32
    return %c0_i32, %c0_i32_0, %c0_i32_1 : i32, i32, i32
  }
  func.func @transform_3(%arg0: i32, %arg1: i32) -> (i32, i32) {
    %c0_i32 = arith.constant 0 : i32
    %c0_i32_0 = arith.constant 0 : i32
    %c0_i32_1 = arith.constant 0 : i32
    return %c0_i32, %c0_i32_0 : i32, i32
  }
  func.func @transform_4(%arg0: i32, %arg1: i32) -> (i32, i32) {
    %c0_i32 = arith.constant 0 : i32
    %c0_i32_0 = arith.constant 0 : i32
    %c0_i32_1 = arith.constant 0 : i32
    return %c0_i32, %c0_i32_0 : i32, i32
  }
  func.func @transform_5(%arg0: i32, %arg1: i32) -> (i32, i32) {
    %c0_i32 = arith.constant 0 : i32
    %c0_i32_0 = arith.constant 0 : i32
    %c0_i32_1 = arith.constant 0 : i32
    return %c0_i32, %c0_i32_0 : i32, i32
  }
  func.func @transform_6(%arg0: i32, %arg1: i32) -> (i32, i32, i32) {
    %c0_i32 = arith.constant 0 : i32
    %c0_i32_0 = arith.constant 0 : i32
    return %arg0, %arg1, %c0_i32 : i32, i32, i32
  }
  func.func @transform_7(%arg0: i32, %arg1: i32) -> (i32, i32, i32) {
    %c0_i32 = arith.constant 0 : i32
    %c0_i32_0 = arith.constant 0 : i32
    return %arg0, %arg1, %c0_i32 : i32, i32, i32
  }
}

</mosaic_0001>

<bundles_post_ra>
// kernel: residual_block.1
= control target key start
LH: loop header
LB: loop body
LE: loop exit
PB: predicated region body
PF: predicated region fallthrough
CT: control target
= control target key end

     0   :  { %s2160_s24 = smov 0   ;;  %s2162_s25 = smov 0   ;;  %s2911_s0 = inlined_call_operand.vmem [shape: f32[2,256,128], index: 0, kind: input, shape index: {}]   ;;  %s2912_s1 = inlined_call_operand.vmem [shape: f32[2,2,8,128], index: 1, kind: input, shape index: {}]   ;;  %s2913_s2 = inlined_call_operand.vmem [shape: f32[3,128,256], index: 2, kind: input, shape index: {}]   ;;  %s2914_s3 = inlined_call_operand.vmem [shape: f32[1,256], index: 3, kind: input, shape index: {}]   ;;  %s2915_s4 = inlined_call_operand.vmem [shape: f32[128,128], index: 4, kind: input, shape index: {}]   ;;  %s2916_s5 = inlined_call_operand.vmem [shape: f32[1,128], index: 5, kind: input, shape index: {}]   ;;  %s2917_s6 = inlined_call_operand.vmem [shape: f32[2,256,128], index: 6, kind: output, shape index: {0}]   ;;  %s2918_s7 = inlined_call_operand.vmem [shape: f32[2,256,128], index: 7, kind: output, shape index: {1}]  }
   0x1   :  { %s2164_s26 = smov 0   ;;  %s2166_s27 = smov 0  }
   0x2   :  { %s2168_s28 = smov 0  }
   0x3 LB: > { %s27_s29 = sadd.s32 1, %s2109_s26  ;;  %s30_s30 = sadd.s32 1, %s2113_s27  ;;  %s2117_s28 = sphi %s2168_s28, %s18_s28   ;;  %s2113_s27 = sphi %s2166_s27, %s2922_s27   ;;  %s2109_s26 = sphi %s2164_s26, %s2921_s26   ;;  %s2105_s25 = sphi %s2162_s25, %s2920_s25   ;;  %s2101_s24 = sphi %s2160_s24, %s2919_s24  }
   0x4   : > { %p28_p0 = scmp.ge.s32.totalorder %s27_s29, 2  ;;  %p1586_p1 = scmp.ge.s32.totalorder %s2117_s28, 1 }
   0x5   : > { %p278_p2 = scmp.lt.s32.totalorder %s2117_s28, 5 }
   0x6   : > { %s2924_s29 = smov (%p28_p0, %s27_s29), 0  ;;  %s2926_s30 = smov (!%p28_p0, %s30_s30), %s2113_s27 }
   0x7   : > { %p279_p3 = pnand %p1586_p1, %p278_p2  ;;  %p32_p4 = scmp.ge.s32.totalorder %s2926_s30, 2 }
   0x8   : > { %v1599_v0 = vld [vmem:[%s2913_s2 + $0x208] sm:$0xff] (!%p279_p3)  ;;  %v1601_v1 = vld [vmem:[%s2913_s2 + $0x218] sm:$0xff] (!%p279_p3)  ;;  %v1598_v2 = vld [vmem:[%s2913_s2 + $0x200] sm:$0xff] (!%p279_p3)  ;;  %s1587_s14 = sshll.u32 (!%p279_p3), %s2101_s24, 4  ;;  %p336_p5 = scmp.lt.s32.totalorder (!%p279_p3), %s2105_s25, 1  ;;  %v2119_v7 = vmov (!%p279_p3), 0.0  }
   0x9   : > { %s2928_s30 = smov (%p32_p4, %s2926_s30), 0  ;;  %282 = sbr.rel (%p279_p3) target bundleno = 629 (0x275), region = 44 }
   0xa   : > { %v1801_v3 = vpack.c.bf16 (!%p279_p3), %v1601_v1, %v1599_v0  ;;  %v1600_v4 = vld [vmem:[%s2913_s2 + $0x210] sm:$0xff] (!%p279_p3)  ;;  %v1603_v5 = vld [vmem:[%s2913_s2 + $0x228] sm:$0xff] (!%p279_p3)  ;;  %v1605_v6 = vld [vmem:[%s2913_s2 + $0x238] sm:$0xff] (!%p279_p3)  ;;  %713 = vmatprep.mubr.f32.mxu0 (!%p279_p3), %v2119_v7  ;;  %p338_p6 = scmp.lt.s32.totalorder (!%p279_p3), %s1587_s14, 31  ;;  %552 = vmatprep.mubr.f32.mxu1 (!%p279_p3), %v2119_v7  ;;  %p347_p7 = scmp.lt.s32.totalorder (!%p279_p3), %s2101_s24, 1 }
   0xb   : > { %v1803_v8 = vpack.c.bf16 (!%p279_p3), %v1600_v4, %v1598_v2  ;;  %v1805_v9 = vpack.c.bf16 (!%p279_p3), %v1605_v6, %v1603_v5  ;;  %v1602_v10 = vld [vmem:[%s2913_s2 + $0x220] sm:$0xff] (!%p279_p3)  ;;  %v1604_v11 = vld [vmem:[%s2913_s2 + $0x230] sm:$0xff] (!%p279_p3)  ;;  %v1607_v12 = vld [vmem:[%s2913_s2 + $0x248] sm:$0xff] (!%p279_p3) }
   0xc   : > { %1802 = vmatprep.subr.bf16.mxu0 (!%p279_p3), %v1801_v3  ;;  %v1609_v13 = vld [vmem:[%s2913_s2 + $0x258] sm:$0xff] (!%p279_p3)  ;;  %v1807_v14 = vpack.c.bf16 (!%p279_p3), %v1604_v11, %v1602_v10  ;;  %v1606_v16 = vld [vmem:[%s2913_s2 + $0x240] sm:$0xff] (!%p279_p3)  ;;  %v1608_v17 = vld [vmem:[%s2913_s2 + $0x250] sm:$0xff] (!%p279_p3) }
   0xd   : > { %1804 = vmatpush1.bf16.msra.mxu0 (!%p279_p3), %v1803_v8  ;;  %v1809_v15 = vpack.c.bf16 (!%p279_p3), %v1609_v13, %v1607_v12  ;;  %v1611_v18 = vld [vmem:[%s2913_s2 + $0x268] sm:$0xff] (!%p279_p3)  ;;  %v1613_v19 = vld [vmem:[%s2913_s2 + $0x278] sm:$0xff] (!%p279_p3)  ;;  %v1811_v20 = vpack.c.bf16 (!%p279_p3), %v1608_v17, %v1606_v16  ;;  %v1610_v22 = vld [vmem:[%s2913_s2 + $0x260] sm:$0xff] (!%p279_p3) }
   0xe   : > { %1806 = vmatprep.subr.bf16.mxu0 (!%p279_p3), %v1805_v9  ;;  %v1813_v21 = vpack.c.bf16 (!%p279_p3), %v1613_v19, %v1611_v18  ;;  %v1612_v23 = vld [vmem:[%s2913_s2 + $0x270] sm:$0xff] (!%p279_p3)  ;;  %v1615_v24 = vld [vmem:[%s2913_s2 + $0x288] sm:$0xff] (!%p279_p3)  ;;  %v1617_v25 = vld [vmem:[%s2913_s2 + $0x298] sm:$0xff] (!%p279_p3) }
   0xf   : > { %v1815_v27 = vpack.c.bf16 (!%p279_p3), %v1612_v23, %v1610_v22  ;;  %v1817_v30 = vpack.c.bf16 (!%p279_p3), %v1617_v25, %v1615_v24  ;;  %v1614_v31 = vld [vmem:[%s2913_s2 + $0x280] sm:$0xff] (!%p279_p3)  ;;  %v1616_v32 = vld [vmem:[%s2913_s2 + $0x290] sm:$0xff] (!%p279_p3)  ;;  %v1619_v33 = vld [vmem:[%s2913_s2 + $0x2a8] sm:$0xff] (!%p279_p3) }
  0x10   : > { %s2930_s25 = smov (!%p336_p5, %s2105_s25), 1  ;;  %s2932_s14 = smov (!%p338_p6, %s1587_s14), 31  ;;  %v1621_v34 = vld [vmem:[%s2913_s2 + $0x2b8] sm:$0xff]  ;;  %v1819_v37 = vpack.c.bf16 %v1616_v32, %v1614_v31  ;;  %v1618_v41 = vld [vmem:[%s2913_s2 + $0x2a0] sm:$0xff]  ;;  %v1620_v42 = vld [vmem:[%s2913_s2 + $0x2b0] sm:$0xff] }
  0x11   : > { %s1588_s13 = sshll.u32 %s2930_s25, 5  ;;  %1808 = vmatpush1.bf16.msra.mxu0 %v1807_v14  ;;  %v1821_v40 = vpack.c.bf16 %v1621_v34, %v1619_v33  ;;  %v1623_v43 = vld [vmem:[%s2913_s2 + $0x2c8] sm:$0xff]  ;;  %v1625_v44 = vld [vmem:[%s2913_s2 + $0x2d8] sm:$0xff]  ;;  %v1622_v47 = vld [vmem:[%s2913_s2 + $0x2c0] sm:$0xff]  ;;  %v1823_v50 = vpack.c.bf16 %v1620_v42, %v1618_v41  ;;  %s2934_s24 = smov (!%p347_p7, %s2101_s24), 1 }
  0x12   : > { %s341_s19 = sadd.s32 %s1588_s13, %s2932_s14  ;;  %1810 = vmatprep.subr.bf16.mxu0 %v1809_v15  ;;  %v457_v46 = vld [vmem:[%s2913_s2 + $0x8] sm:$0xff]  ;;  %v459_v48 = vld [vmem:[%s2913_s2 + $0x18] sm:$0xff]  ;;  %v1624_v51 = vld [vmem:[%s2913_s2 + $0x2d0] sm:$0xff]  ;;  %v1825_v55 = vpack.c.bf16 %v1625_v44, %v1623_v43  ;;  %s1590_s18 = sshll.u32 %s2930_s25, 1 }
  0x13   : > { %s2246_s8 = sshll.u32 %s341_s19, 3  ;;  %v1769_v52 = vpack.c.bf16 %v459_v48, %v457_v46  ;;  %v456_v53 = vld [vmem:[%s2913_s2] sm:$0xff]  ;;  %v458_v54 = vld [vmem:[%s2913_s2 + $0x10] sm:$0xff]  ;;  %v1627_v56 = vld [vmem:[%s2913_s2 + $0x2e8] sm:$0xff]  ;;  %v1827_v3 = vpack.c.bf16 %v1624_v51, %v1622_v47  ;;  %s2418_s13 = sadd.s32 %s1590_s18, %s2934_s24 }
  0x14   : > { %s2252_s11 = scalar_lea.vmem %s2911_s0, %s2246_s8  ;;  %v1629_v57 = vld [vmem:[%s2913_s2 + $0x2f8] sm:$0xff]  ;;  %v1771_v58 = vpack.c.bf16 %v458_v54, %v456_v53  ;;  %v461_v59 = vld [vmem:[%s2913_s2 + $0x28] sm:$0xff]  ;;  %v460_v62 = vld [vmem:[%s2913_s2 + $0x20] sm:$0xff]  ;;  %s1591_s10 = sshll.u32 %s2418_s13, 3 }
  0x15   : > { %v2267_v26 = vld [vmem:[%s2252_s11] sm:$0xff]  ;;  %1812 = vmatpush1.bf16.msra.mxu0 %v1811_v20  ;;  %v2271_v28 = vld [vmem:[%s2252_s11 + $0x8] sm:$0xff]  ;;  %v2274_v29 = vld [vmem:[%s2252_s11 + $0x10] sm:$0xff]  ;;  %1770 = vmatprep.subr.bf16.mxu1 %v1769_v52  ;;  %v1829_v10 = vpack.c.bf16 %v1629_v57, %v1627_v56  ;;  %s352_s16 = scalar_lea.vmem %s2912_s1, %s1591_s10  ;;  %s2780_s15 = scalar_lea.vmem %s2917_s6, %s2246_s8 }
  0x16   : > { %391 = vst [vmem:[#allocation2 + $0x8] sm:$0xff] %v2267_v26  ;;  %1814 = vmatprep.subr.bf16.mxu0 %v1813_v21  ;;  %392 = vst [vmem:[#allocation2 + $0x10] sm:$0xff] %v2271_v28  ;;  %v2291_v35 = vld [vmem:[%s2252_s11 + $0x18] sm:$0xff]  ;;  %v2294_v36 = vld [vmem:[%s2252_s11 + $0x20] sm:$0xff]  ;;  %1772 = vmatpush1.bf16.msra.mxu1 %v1771_v58  ;;  %s2878_s20 = scalar_lea.vmem %s2918_s7, %s2246_s8 }
  0x17   : > { %393 = vst [vmem:[#allocation2 + $0x18] sm:$0xff] %v2274_v29  ;;  %394 = vst [vmem:[#allocation2 + $0x20] sm:$0xff] %v2291_v35  ;;  %v2299_v38 = vld [vmem:[%s2252_s11 + $0x28] sm:$0xff]  ;;  %v2302_v39 = vld [vmem:[%s2252_s11 + $0x30] sm:$0xff] }
  0x18   : > { %395 = vst [vmem:[#allocation2 + $0x28] sm:$0xff] %v2294_v36  ;;  %396 = vst [vmem:[#allocation2 + $0x30] sm:$0xff] %v2299_v38  ;;  %v2319_v45 = vld [vmem:[%s2252_s11 + $0x38] sm:$0xff]  ;;  %v2332_v49 = vld [vmem:[%s2252_s11 + $0x40] sm:$0xff] }
  0x19   : > { %1816 = vmatpush1.bf16.msra.mxu0 %v1815_v27  ;;  %397 = vst [vmem:[#allocation2 + $0x38] sm:$0xff] %v2302_v39  ;;  %398 = vst [vmem:[#allocation2 + $0x40] sm:$0xff] %v2319_v45  ;;  %v463_v60 = vld [vmem:[%s2913_s2 + $0x38] sm:$0xff]  ;;  %v2358_v61 = vld [vmem:[%s2252_s11 + $0x48] sm:$0xff] }
  0x1a   : > { %1818 = vmatprep.subr.bf16.mxu0 %v1817_v30  ;;  %399 = vst [vmem:[#allocation2 + $0x48] sm:$0xff] %v2332_v49  ;;  %v1773_v63 = vpack.c.bf16 %v463_v60, %v461_v59  ;;  %400 = vst [vmem:[#allocation2 + $0x50] sm:$0xff] %v2358_v61  ;;  %v462_v0 = vld [vmem:[%s2913_s2 + $0x30] sm:$0xff]  ;;  %v465_v1 = vld [vmem:[%s2913_s2 + $0x48] sm:$0xff] }
  0x1b   : > { %v467_v2 = vld [vmem:[%s2913_s2 + $0x58] sm:$0xff]  ;;  %v1626_v4 = vld [vmem:[%s2913_s2 + $0x2e0] sm:$0xff]  ;;  %v1628_v5 = vld [vmem:[%s2913_s2 + $0x2f0] sm:$0xff]  ;;  %v1775_v6 = vpack.c.bf16 %v462_v0, %v460_v62 }
  0x1c   : > { %v1777_v8 = vpack.c.bf16 %v467_v2, %v465_v1  ;;  %v2380_v9 = vld [vmem:[%s2252_s11 + $0x50] sm:$0xff]  ;;  %v1631_v11 = vld [vmem:[%s2913_s2 + $0x108] sm:$0xff]  ;;  %1774 = vmatprep.subr.bf16.mxu1 %v1773_v63  ;;  %v464_v12 = vld [vmem:[%s2913_s2 + $0x40] sm:$0xff]  ;;  %v1831_v19 = vpack.c.bf16 %v1628_v5, %v1626_v4 }
  0x1d   : > { %1820 = vmatpush1.bf16.msra.mxu0 %v1819_v37  ;;  %401 = vst [vmem:[#allocation2 + $0x58] sm:$0xff] %v2380_v9  ;;  %v466_v13 = vld [vmem:[%s2913_s2 + $0x50] sm:$0xff]  ;;  %v1633_v14 = vld [vmem:[%s2913_s2 + $0x118] sm:$0xff]  ;;  %v469_v15 = vld [vmem:[%s2913_s2 + $0x68] sm:$0xff]  ;;  %1776 = vmatpush1.bf16.msra.mxu1 %v1775_v6 }
  0x1e   : > { %1822 = vmatprep.subr.bf16.mxu0 %v1821_v40  ;;  %v471_v16 = vld [vmem:[%s2913_s2 + $0x78] sm:$0xff]  ;;  %v1779_v17 = vpack.c.bf16 %v466_v13, %v464_v12  ;;  %1778 = vmatprep.subr.bf16.mxu1 %v1777_v8  ;;  %v468_v21 = vld [vmem:[%s2913_s2 + $0x60] sm:$0xff]  ;;  %v470_v22 = vld [vmem:[%s2913_s2 + $0x70] sm:$0xff]  ;;  %v1833_v24 = vpack.c.bf16 %v1633_v14, %v1631_v11 }
  0x1f   : > { %v2406_v18 = vld [vmem:[%s2252_s11 + $0x58] sm:$0xff]  ;;  %v1781_v20 = vpack.c.bf16 %v471_v16, %v469_v15  ;;  %v2416_v23 = vld [vmem:[%s2252_s11 + $0x60] sm:$0xff]  ;;  %v1632_v27 = vld [vmem:[%s2913_s2 + $0x110] sm:$0xff]  ;;  %v1783_v34 = vpack.c.bf16 %v470_v22, %v468_v21 }
  0x20   : > { %402 = vst [vmem:[#allocation2 + $0x60] sm:$0xff] %v2406_v18  ;;  %v1630_v25 = vld [vmem:[%s2913_s2 + $0x100] sm:$0xff]  ;;  %v1635_v30 = vld [vmem:[%s2913_s2 + $0x128] sm:$0xff]  ;;  %403 = vst [vmem:[#allocation2 + $0x68] sm:$0xff] %v2416_v23 }
  0x21   : > { %1824 = vmatpush1.bf16.msra.mxu0 %v1823_v50  ;;  %v1637_v31 = vld [vmem:[%s2913_s2 + $0x138] sm:$0xff]  ;;  %v473_v32 = vld [vmem:[%s2913_s2 + $0x88] sm:$0xff]  ;;  %1780 = vmatpush1.bf16.msra.mxu1 %v1779_v17  ;;  %v1835_v40 = vpack.c.bf16 %v1632_v27, %v1630_v25  ;;  %v1634_v41 = vld [vmem:[%s2913_s2 + $0x120] sm:$0xff] }
  0x22   : > { %1826 = vmatprep.subr.bf16.mxu0 %v1825_v55  ;;  %v475_v33 = vld [vmem:[%s2913_s2 + $0x98] sm:$0xff]  ;;  %v2440_v37 = vld [vmem:[%s2252_s11 + $0x68] sm:$0xff]  ;;  %1782 = vmatprep.subr.bf16.mxu1 %v1781_v20  ;;  %v472_v42 = vld [vmem:[%s2913_s2 + $0x80] sm:$0xff]  ;;  %v1837_v44 = vpack.c.bf16 %v1637_v31, %v1635_v30 }
  0x23   : > { %v474_v43 = vld [vmem:[%s2913_s2 + $0x90] sm:$0xff]  ;;  %404 = vst [vmem:[#allocation2 + $0x70] sm:$0xff] %v2440_v37  ;;  %v1639_v47 = vld [vmem:[%s2913_s2 + $0x148] sm:$0xff]  ;;  %v1785_v48 = vpack.c.bf16 %v475_v33, %v473_v32  ;;  %v1641_v51 = vld [vmem:[%s2913_s2 + $0x158] sm:$0xff] }
  0x24   : > { %v1636_v46 = vld [vmem:[%s2913_s2 + $0x130] sm:$0xff]  ;;  %v477_v52 = vld [vmem:[%s2913_s2 + $0xa8] sm:$0xff]  ;;  %v479_v53 = vld [vmem:[%s2913_s2 + $0xb8] sm:$0xff]  ;;  %v1787_v55 = vpack.c.bf16 %v474_v43, %v472_v42  ;;  %v1841_v60 = vpack.c.bf16 %v1641_v51, %v1639_v47 }
  0x25   : > { %1828 = vmatpush1.bf16.msra.mxu0 %v1827_v3  ;;  %v2460_v50 = vld [vmem:[%s2252_s11 + $0x70] sm:$0xff]  ;;  %v1638_v54 = vld [vmem:[%s2913_s2 + $0x140] sm:$0xff]  ;;  %1784 = vmatpush1.bf16.msra.mxu1 %v1783_v34  ;;  %v1839_v56 = vpack.c.bf16 %v1636_v46, %v1634_v41  ;;  %v2487_v59 = vld [vmem:[%s2252_s11 + $0x78] sm:$0xff]  ;;  %v1789_v0 = vpack.c.bf16 %v479_v53, %v477_v52 }
  0x26   : > { %1830 = vmatprep.subr.bf16.mxu0 %v1829_v10  ;;  %405 = vst [vmem:[#allocation2 + $0x78] sm:$0xff] %v2460_v50  ;;  %v476_v57 = vld [vmem:[%s2913_s2 + $0xa0] sm:$0xff]  ;;  %v478_v58 = vld [vmem:[%s2913_s2 + $0xb0] sm:$0xff]  ;;  %v1643_v63 = vld [vmem:[%s2913_s2 + $0x168] sm:$0xff]  ;;  %1786 = vmatprep.subr.bf16.mxu1 %v1785_v48 }
  0x27   : > { %v1640_v62 = vld [vmem:[%s2913_s2 + $0x150] sm:$0xff]  ;;  %406 = vst [vmem:[#allocation2 + $0x80] sm:$0xff] %v2487_v59  ;;  %v389_v1 = vld [vmem:[%s352_s16] sm:$0xff]  ;;  %v1645_v2 = vld [vmem:[%s2913_s2 + $0x178] sm:$0xff]  ;;  %v1791_v5 = vpack.c.bf16 %v478_v58, %v476_v57 }
  0x28   : > { %v481_v3 = vld [vmem:[%s2913_s2 + $0xc8] sm:$0xff]  ;;  %v483_v4 = vld [vmem:[%s2913_s2 + $0xd8] sm:$0xff]  ;;  %390 = vst [vmem:[#allocation2] sm:$0xff] %v389_v1  ;;  %v1843_v6 = vpack.c.bf16 %v1640_v62, %v1638_v54  ;;  %v480_v8 = vld [vmem:[%s2913_s2 + $0xc0] sm:$0xff]  ;;  %v1845_v11 = vpack.c.bf16 %v1645_v2, %v1643_v63 }
  0x29   : > { %1832 = vmatpush1.bf16.msra.mxu0 %v1831_v19  ;;  %1788 = vmatpush1.bf16.msra.mxu1 %v1787_v55  ;;  %v482_v10 = vld [vmem:[%s2913_s2 + $0xd0] sm:$0xff]  ;;  %v1642_v12 = vld [vmem:[%s2913_s2 + $0x160] sm:$0xff]  ;;  %v1647_v14 = vld [vmem:[%s2913_s2 + $0x188] sm:$0xff]  ;;  %v1793_v15 = vpack.c.bf16 %v483_v4, %v481_v3 }
  0x2a   : > { %1834 = vmatprep.subr.bf16.mxu0 %v1833_v24  ;;  %v1644_v13 = vld [vmem:[%s2913_s2 + $0x170] sm:$0xff]  ;;  %1790 = vmatprep.subr.bf16.mxu1 %v1789_v0  ;;  %v1649_v16 = vld [vmem:[%s2913_s2 + $0x198] sm:$0xff]  ;;  %v485_v17 = vld [vmem:[%s2913_s2 + $0xe8] sm:$0xff]  ;;  %v1795_v20 = vpack.c.bf16 %v482_v10, %v480_v8 }
  0x2b   : > { %v487_v19 = vld [vmem:[%s2913_s2 + $0xf8] sm:$0xff]  ;;  %v1847_v21 = vpack.c.bf16 %v1644_v13, %v1642_v12  ;;  %v484_v22 = vld [vmem:[%s2913_s2 + $0xe0] sm:$0xff]  ;;  %v486_v24 = vld [vmem:[%s2913_s2 + $0xf0] sm:$0xff]  ;;  %v1849_v25 = vpack.c.bf16 %v1649_v16, %v1647_v14 }
  0x2c   : > { %714 = vmatmul.mubr.f32.vlgmr.msra.gmra.mrb[0].mxu0 %v2267_v26  ;;  %v1646_v27 = vld [vmem:[%s2913_s2 + $0x180] sm:$0xff]  ;;  %v1648_v30 = vld [vmem:[%s2913_s2 + $0x190] sm:$0xff]  ;;  %v1797_v31 = vpack.c.bf16 %v487_v19, %v485_v17  ;;  %v1651_v32 = vld [vmem:[%s2913_s2 + $0x1a8] sm:$0xff]  ;;  %v1799_v34 = vpack.c.bf16 %v486_v24, %v484_v22 }
  0x2d   : > { %1836 = vmatpush1.bf16.msra.mxu0 %v1835_v40  ;;  %719 = vmatprep.mubr.f32.mxu0 %v2119_v7  ;;  %v1653_v33 = vld [vmem:[%s2913_s2 + $0x1b8] sm:$0xff]  ;;  %v1851_v40 = vpack.c.bf16 %v1648_v30, %v1646_v27  ;;  %v1650_v42 = vld [vmem:[%s2913_s2 + $0x1a0] sm:$0xff]  ;;  %v1652_v43 = vld [vmem:[%s2913_s2 + $0x1b0] sm:$0xff] }
  0x2e   : > { %1838 = vmatprep.subr.bf16.mxu0 %v1837_v44  ;;  %1792 = vmatpush1.bf16.msra.mxu1 %v1791_v5  ;;  %v1853_v41 = vpack.c.bf16 %v1653_v33, %v1651_v32  ;;  %v1657_v44 = vld [vmem:[%s2913_s2 + $0x1d8] sm:$0xff]  ;;  %v1855_v47 = vpack.c.bf16 %v1652_v43, %v1650_v42  ;;  %v1654_v51 = vld [vmem:[%s2913_s2 + $0x1c0] sm:$0xff]  ;;  %v1656_v52 = vld [vmem:[%s2913_s2 + $0x1d0] sm:$0xff] }
  0x2f   : > { %1794 = vmatprep.subr.bf16.mxu1 %v1793_v15  ;;  %v440_v46 = vld [vmem:[#allocation2 + $0x4] sm:$0xff]  ;;  %v1661_v53 = vld [vmem:[%s2913_s2 + $0x1f8] sm:$0xff]  ;;  %v441_v54 = vld [vmem:[#allocation2 + $0xc] sm:$0xff]  ;;  %v1859_v55 = vpack.c.bf16 %v1656_v52, %v1654_v51 }
  0x30   : > { %720 = vmatmul.mubr.f32.gmra.mrb[2].mxu0 %v2271_v28  ;;  %v1658_v57 = vld [vmem:[%s2913_s2 + $0x1e0] sm:$0xff]  ;;  %v1660_v58 = vld [vmem:[%s2913_s2 + $0x1f0] sm:$0xff]  ;;  %v1213_v30 = vld [vmem:[%s2915_s4 + $0x28] sm:$0xff] }
  0x31   : > { %725 = vmatprep.mubr.f32.mxu0 %v2119_v7  ;;  %1840 = vmatpush1.bf16.msra.mxu0 %v1839_v56  ;;  %v443_v62 = vld [vmem:[#allocation2 + $0x1c] sm:$0xff]  ;;  %v446_v63 = vld [vmem:[#allocation2 + $0x34] sm:$0xff]  ;;  %v452_v0 = vld [vmem:[#allocation2 + $0x64] sm:$0xff] }
  0x32   : > { %1842 = vmatprep.subr.bf16.mxu0 %v1841_v60  ;;  %1796 = vmatpush1.bf16.msra.mxu1 %v1795_v20  ;;  %v1863_v60 = vpack.c.bf16 %v1660_v58, %v1658_v57  ;;  %v453_v1 = vld [vmem:[#allocation2 + $0x6c] sm:$0xff]  ;;  %v454_v2 = vld [vmem:[#allocation2 + $0x74] sm:$0xff]  ;;  %v813_v3 = vld [vmem:[#allocation2 + $0x1e] sm:$0xff] }
  0x33   : > { %1798 = vmatprep.subr.bf16.mxu1 %v1797_v31  ;;  %v455_v4 = vld [vmem:[#allocation2 + $0x7c] sm:$0xff]  ;;  %v814_v5 = vld [vmem:[#allocation2 + $0x26] sm:$0xff]  ;;  %v819_v12 = vld [vmem:[#allocation2 + $0x4e] sm:$0xff] }
  0x34   : > { %726 = vmatmul.mubr.f32.gmra.mrb[4].mxu0 %v2274_v29  ;;  %v816_v8 = vld [vmem:[#allocation2 + $0x36] sm:$0xff]  ;;  %v817_v10 = vld [vmem:[#allocation2 + $0x3e] sm:$0xff]  ;;  %v822_v15 = vld [vmem:[#allocation2 + $0x66] sm:$0xff] }
  0x35   : > { %731 = vmatprep.mubr.f32.mxu0 %v2119_v7  ;;  %1844 = vmatpush1.bf16.msra.mxu0 %v1843_v6  ;;  %v815_v6 = vld [vmem:[#allocation2 + $0x2e] sm:$0xff]  ;;  %v820_v13 = vld [vmem:[#allocation2 + $0x56] sm:$0xff]  ;;  %v821_v14 = vld [vmem:[#allocation2 + $0x5e] sm:$0xff] }
  0x36   : > { %1846 = vmatprep.subr.bf16.mxu0 %v1845_v11  ;;  %1800 = vmatpush1.bf16.msra.mxu1 %v1799_v34  ;;  %v818_v11 = vld [vmem:[#allocation2 + $0x46] sm:$0xff]  ;;  %v823_v16 = vld [vmem:[#allocation2 + $0x6e] sm:$0xff]  ;;  %v824_v17 = vld [vmem:[#allocation2 + $0x76] sm:$0xff] }
  0x37   : > { %v825_v19 = vld [vmem:[#allocation2 + $0x7e] sm:$0xff]  ;;  %v1210_v24 = vld [vmem:[%s2915_s4 + $0x10] sm:$0xff] }
  0x38   : > { %732 = vmatmul.mubr.f32.gmra.mrb[6].mxu0 %v2291_v35  ;;  %v1655_v35 = vld [vmem:[%s2913_s2 + $0x1c8] sm:$0xff]  ;;  %v1208_v20 = vld [vmem:[%s2915_s4] sm:$0xff]  ;;  %v1214_v32 = vld [vmem:[%s2915_s4 + $0x30] sm:$0xff] }
  0x39   : > { %737 = vmatprep.mubr.f32.mxu0 %v2119_v7  ;;  %1848 = vmatpush1.bf16.msra.mxu0 %v1847_v21  ;;  %v1857_v48 = vpack.c.bf16 %v1657_v44, %v1655_v35  ;;  %v1209_v21 = vld [vmem:[%s2915_s4 + $0x8] sm:$0xff]  ;;  %v1212_v27 = vld [vmem:[%s2915_s4 + $0x20] sm:$0xff]  ;;  %v1215_v33 = vld [vmem:[%s2915_s4 + $0x38] sm:$0xff] }
  0x3a   : > { %1850 = vmatprep.subr.bf16.mxu0 %v1849_v25  ;;  %553 = vmatmul.mubr.f32.vlgmr.msra.gmra.mrb[0].mxu1 %v440_v46  ;;  %v1865_v22 = vpack.c.bf16 %v1209_v21, %v1208_v20  ;;  %v1873_v31 = vpack.c.bf16 %v1213_v30, %v1212_v27  ;;  %v1877_v34 = vpack.c.bf16 %v1215_v33, %v1214_v32  ;;  %v1218_v43 = vld [vmem:[%s2915_s4 + $0x50] sm:$0xff]  ;;  %v1219_v35 = vld [vmem:[%s2915_s4 + $0x58] sm:$0xff]  ;;  %v1220_v46 = vld [vmem:[%s2915_s4 + $0x60] sm:$0xff] }
  0x3b   : > { %558 = vmatprep.mubr.f32.mxu1 %v2119_v7  ;;  %v1885_v44 = vpack.c.bf16 %v1219_v35, %v1218_v43  ;;  %v1222_v51 = vld [vmem:[%s2915_s4 + $0x70] sm:$0xff]  ;;  %v1223_v52 = vld [vmem:[%s2915_s4 + $0x78] sm:$0xff] }
  0x3c   : > { %738 = vmatmul.mubr.f32.gmra.mrb[8].mxu0 %v2294_v36  ;;  %v1659_v36 = vld [vmem:[%s2913_s2 + $0x1e8] sm:$0xff]  ;;  %1866 = vmatprep.subr.bf16.mxu1 %v1865_v22 }
  0x3d   : > { %743 = vmatprep.mubr.f32.mxu0 %v2119_v7  ;;  %1852 = vmatpush1.bf16.msra.mxu0 %v1851_v40  ;;  %v1861_v56 = vpack.c.bf16 %v1661_v53, %v1659_v36  ;;  %v1216_v40 = vld [vmem:[%s2915_s4 + $0x40] sm:$0xff]  ;;  %v1893_v36 = vpack.c.bf16 %v1223_v52, %v1222_v51 }
  0x3e   : > { %1854 = vmatprep.subr.bf16.mxu0 %v1853_v41  ;;  %559 = vmatmul.mubr.f32.gmra.mrb[2].mxu1 %v441_v54  ;;  %v1217_v41 = vld [vmem:[%s2915_s4 + $0x48] sm:$0xff] }
  0x3f   : > { %564 = vmatprep.mubr.f32.mxu1 %v2119_v7  ;;  %1868 = vmatpush3.bf16.msra.mxu1 %v1865_v22  ;;  %v1881_v42 = vpack.c.bf16 %v1217_v41, %v1216_v40 }
  0x40   : > { %744 = vmatmul.mubr.f32.gmra.mrb[10].mxu0 %v2299_v38  ;;  %v442_v38 = vld [vmem:[#allocation2 + $0x14] sm:$0xff] }
  0x41   : > { %749 = vmatprep.mubr.f32.mxu0 %v2119_v7  ;;  %1856 = vmatpush1.bf16.msra.mxu0 %v1855_v47  ;;  %v1221_v47 = vld [vmem:[%s2915_s4 + $0x68] sm:$0xff] }
  0x42   : > { %1858 = vmatprep.subr.bf16.mxu0 %v1857_v48  ;;  %565 = vmatmul.mubr.f32.gmra.mrb[4].mxu1 %v442_v38  ;;  %v1889_v48 = vpack.c.bf16 %v1221_v47, %v1220_v46 }
  0x43   : > { %570 = vmatprep.mubr.f32.mxu1 %v2119_v7 }
  0x44   : > { %750 = vmatmul.mubr.f32.gmra.mrb[12].mxu0 %v2302_v39  ;;  %v444_v39 = vld [vmem:[#allocation2 + $0x24] sm:$0xff] }
  0x45   : > { %755 = vmatprep.mubr.f32.mxu0 %v2119_v7  ;;  %1860 = vmatpush1.bf16.msra.mxu0 %v1859_v55 }
  0x46   : > { %1862 = vmatprep.subr.bf16.mxu0 %v1861_v56  ;;  %571 = vmatmul.mubr.f32.gmra.mrb[6].mxu1 %v443_v62 }
  0x47   : > { %576 = vmatprep.mubr.f32.mxu1 %v2119_v7 }
  0x48   : > { %756 = vmatmul.mubr.f32.gmra.mrb[14].mxu0 %v2319_v45  ;;  %v445_v45 = vld [vmem:[#allocation2 + $0x2c] sm:$0xff] }
  0x49   : > { %761 = vmatprep.mubr.f32.mxu0 %v2119_v7  ;;  %1864 = vmatpush1.bf16.msra.mxu0 %v1863_v60 }
  0x4a   : > { %577 = vmatmul.mubr.f32.gmra.mrb[8].mxu1 %v444_v39 }
  0x4b   : > { %582 = vmatprep.mubr.f32.mxu1 %v2119_v7 }
  0x4c   : > { %762 = vmatmul.mubr.f32.gmra.mrb[16].mxu0 %v2332_v49  ;;  %v447_v49 = vld [vmem:[#allocation2 + $0x3c] sm:$0xff] }
  0x4d   : > { %767 = vmatprep.mubr.f32.mxu0 %v2119_v7 }
  0x4e   : > { %583 = vmatmul.mubr.f32.gmra.mrb[10].mxu1 %v445_v45 }
  0x4f   : > { %588 = vmatprep.mubr.f32.mxu1 %v2119_v7 }
  0x50   : > { %768 = vmatmul.mubr.f32.gmra.mrb[18].mxu0 %v2358_v61  ;;  %v448_v61 = vld [vmem:[#allocation2 + $0x44] sm:$0xff] }
  0x51   : > { %773 = vmatprep.mubr.f32.mxu0 %v2119_v7 }
  0x52   : > { %589 = vmatmul.mubr.f32.gmra.mrb[12].mxu1 %v446_v63 }
  0x53   : > { %594 = vmatprep.mubr.f32.mxu1 %v2119_v7 }
  0x54   : > { %774 = vmatmul.mubr.f32.gmra.mrb[20].mxu0 %v2380_v9  ;;  %v449_v9 = vld [vmem:[#allocation2 + $0x4c] sm:$0xff] }
  0x55   : > { %779 = vmatprep.mubr.f32.mxu0 %v2119_v7 }
  0x56   : > { %595 = vmatmul.mubr.f32.gmra.mrb[14].mxu1 %v447_v49 }
  0x57   : > { %600 = vmatprep.mubr.f32.mxu1 %v2119_v7 }
  0x58   : > { %780 = vmatmul.mubr.f32.gmra.mrb[22].mxu0 %v2406_v18  ;;  %v450_v18 = vld [vmem:[#allocation2 + $0x54] sm:$0xff] }
  0x59   : > { %785 = vmatprep.mubr.f32.mxu0 %v2119_v7 }
  0x5a   : > { %601 = vmatmul.mubr.f32.gmra.mrb[16].mxu1 %v448_v61 }
  0x5b   : > { %606 = vmatprep.mubr.f32.mxu1 %v2119_v7 }
  0x5c   : > { %786 = vmatmul.mubr.f32.gmra.mrb[24].mxu0 %v2416_v23  ;;  %v451_v23 = vld [vmem:[#allocation2 + $0x5c] sm:$0xff] }
  0x5d   : > { %791 = vmatprep.mubr.f32.mxu0 %v2119_v7 }
  0x5e   : > { %607 = vmatmul.mubr.f32.gmra.mrb[18].mxu1 %v449_v9 }
  0x5f   : > { %612 = vmatprep.mubr.f32.mxu1 %v2119_v7 }
  0x60   : > { %792 = vmatmul.mubr.f32.gmra.mrb[26].mxu0 %v2440_v37  ;;  %v810_v37 = vld [vmem:[#allocation2 + $0x6] sm:$0xff] }
  0x61   : > { %797 = vmatprep.mubr.f32.mxu0 %v2119_v7 }
  0x62   : > { %613 = vmatmul.mubr.f32.gmra.mrb[20].mxu1 %v450_v18 }
  0x63   : > { %618 = vmatprep.mubr.f32.mxu1 %v2119_v7 }
  0x64   : > { %798 = vmatmul.mubr.f32.gmra.mrb[28].mxu0 %v2460_v50  ;;  %v811_v50 = vld [vmem:[#allocation2 + $0xe] sm:$0xff] }
  0x65   : > { %803 = vmatprep.mubr.f32.mxu0 %v2119_v7 }
  0x66   : > { %619 = vmatmul.mubr.f32.gmra.mrb[22].mxu1 %v451_v23 }
  0x67   : > { %624 = vmatprep.mubr.f32.mxu1 %v2119_v7 }
  0x68   : > { %804 = vmatmul.mubr.f32.gmra.mrb[30].mxu0 %v2487_v59  ;;  %v812_v59 = vld [vmem:[#allocation2 + $0x16] sm:$0xff] }
  0x69   : > { %923 = vmatprep.mubr.f32.mxu0 %v2119_v7 }
  0x6a   : > { %625 = vmatmul.mubr.f32.gmra.mrb[24].mxu1 %v452_v0 }
  0x6b   : > { %630 = vmatprep.mubr.f32.mxu1 %v2119_v7 }
  0x6c   : > { %924 = vmatmul.mubr.f32.vlgmr.msra.gmra.mrb[0].mxu0 %v810_v37  ;;  %v1054_v37 = vlaneseq }
  0x6d   : > { %929 = vmatprep.mubr.f32.mxu0 %v2119_v7 }
  0x6e   : > { %631 = vmatmul.mubr.f32.gmra.mrb[26].mxu1 %v453_v1  ;;  %v2703_v1 = vshrl.u32 %v1054_v37, 7 }
  0x6f   : > { %636 = vmatprep.mubr.f32.mxu1 %v2119_v7 }
  0x70   : > { %930 = vmatmul.mubr.f32.gmra.mrb[2].mxu0 %v811_v50 }
  0x71   : > { %935 = vmatprep.mubr.f32.mxu0 %v2119_v7 }
  0x72   : > { %637 = vmatmul.mubr.f32.gmra.mrb[28].mxu1 %v454_v2 }
  0x73   : > { %642 = vmatprep.mubr.f32.mxu1 %v2119_v7 }
  0x74   : > { %936 = vmatmul.mubr.f32.gmra.mrb[4].mxu0 %v812_v59 }
  0x75   : > { %941 = vmatprep.mubr.f32.mxu0 %v2119_v7 }
  0x76   : > { %643 = vmatmul.mubr.f32.gmra.mrb[30].mxu1 %v455_v4 }
  0x78   : > { %942 = vmatmul.mubr.f32.gmra.mrb[6].mxu0 %v813_v3  ;;  %v1060_v3 = vsub.s32 1, %v2703_v1 }
  0x79   : > { %947 = vmatprep.mubr.f32.mxu0 %v2119_v7 }
  0x7c   : > { %948 = vmatmul.mubr.f32.gmra.mrb[8].mxu0 %v814_v5  ;;  %v2715_v5 = vld [vmem:[%s2914_s3] sm:$0x3] }
  0x7d   : > { %953 = vmatprep.mubr.f32.mxu0 %v2119_v7 }
  0x80   : > { %954 = vmatmul.mubr.f32.gmra.mrb[10].mxu0 %v815_v6 }
  0x81   : > { %959 = vmatprep.mubr.f32.mxu0 %v2119_v7 }
  0x84   : > { %960 = vmatmul.mubr.f32.gmra.mrb[12].mxu0 %v816_v8 }
  0x85   : > { %965 = vmatprep.mubr.f32.mxu0 %v2119_v7 }
  0x88   : > { %966 = vmatmul.mubr.f32.gmra.mrb[14].mxu0 %v817_v10  ;;  %v2720_v10 = vrot.slane %v2715_v5, %v1060_v3 }
  0x89   : > { %971 = vmatprep.mubr.f32.mxu0 %v2119_v7 }
  0x8c   : > { %972 = vmatmul.mubr.f32.gmra.mrb[16].mxu0 %v818_v11 }
  0x8d   : > { %977 = vmatprep.mubr.f32.mxu0 %v2119_v7 }
  0x90   : > { %978 = vmatmul.mubr.f32.gmra.mrb[18].mxu0 %v819_v12 }
  0x91   : > { %983 = vmatprep.mubr.f32.mxu0 %v2119_v7 }
  0x94   : > { %984 = vmatmul.mubr.f32.gmra.mrb[20].mxu0 %v820_v13 }
  0x95   : > { %989 = vmatprep.mubr.f32.mxu0 %v2119_v7 }
  0x98   : > { %990 = vmatmul.mubr.f32.gmra.mrb[22].mxu0 %v821_v14 }
  0x99   : > { %995 = vmatprep.mubr.f32.mxu0 %v2119_v7 }
  0x9c   : > { %996 = vmatmul.mubr.f32.gmra.mrb[24].mxu0 %v822_v15 }
  0x9d   : > { %1001 = vmatprep.mubr.f32.mxu0 %v2119_v7 }
  0xa0   : > { %1002 = vmatmul.mubr.f32.gmra.mrb[26].mxu0 %v823_v16 }
  0xa1   : > { %1007 = vmatprep.mubr.f32.mxu0 %v2119_v7 }
  0xa4   : > { %1008 = vmatmul.mubr.f32.gmra.mrb[28].mxu0 %v824_v17 }
  0xa5   : > { %1013 = vmatprep.mubr.f32.mxu0 %v2119_v7  ;;  %v1211_v7 = vld [vmem:[%s2915_s4 + $0x18] sm:$0xff] }
  0xa6   : > { %v1869_v25 = vpack.c.bf16 %v1211_v7, %v1210_v24 }
  0xa8   : > { %1014 = vmatmul.mubr.f32.gmra.mrb[30].mxu0 %v825_v19  ;;  %1870 = vmatprep.subr.bf16.mxu1 %v1869_v25 }
  0xa9   : > { %1872 = vmatpush3.bf16.msra.mxu1 %v1869_v25 }
  0xaa   : > { %1874 = vmatprep.subr.bf16.mxu1 %v1873_v31 }
  0xad   : > { %1876 = vmatpush3.bf16.msra.mxu1 %v1873_v31 }
  0xae   : > { %1878 = vmatprep.subr.bf16.mxu1 %v1877_v34 }
  0xb1   : > { %1880 = vmatpush3.bf16.msra.mxu1 %v1877_v34 }
  0xb2   : > { %1882 = vmatprep.subr.bf16.mxu1 %v1881_v42 }
  0xb5   : > { %1884 = vmatpush3.bf16.msra.mxu1 %v1881_v42 }
  0xb6   : > { %1886 = vmatprep.subr.bf16.mxu1 %v1885_v44 }
  0xb9   : > { %1888 = vmatpush3.bf16.msra.mxu1 %v1885_v44 }
  0xba   : > { %1890 = vmatprep.subr.bf16.mxu1 %v1889_v48 }
  0xbd   : > { %1892 = vmatpush3.bf16.msra.mxu1 %v1889_v48 }
  0xbe   : > { %1894 = vmatprep.subr.bf16.mxu1 %v1893_v36 }
  0xc1   : > { %1896 = vmatpush3.bf16.msra.mxu1 %v1893_v36 }
 0x10d   : > { %v554_v53 = vpop.f32.mrb[0].mxu1 }
 0x10e   : > { %v556_v54 = vpop.f32.mrb[1].mxu1 }
 0x111   : > { %v560_v55 = vpop.f32.mrb[2].mxu1 }
 0x112   : > { %v562_v56 = vpop.f32.mrb[3].mxu1 }
 0x115   : > { %v566_v57 = vpop.f32.mrb[4].mxu1 }
 0x116   : > { %v568_v58 = vpop.f32.mrb[5].mxu1 }
 0x119   : > { %v572_v38 = vpop.f32.mrb[6].mxu1 }
 0x11a   : > { %v574_v60 = vpop.f32.mrb[7].mxu1 }
 0x11d   : > { %v578_v62 = vpop.f32.mrb[8].mxu1 }
 0x11e   : > { %v580_v39 = vpop.f32.mrb[9].mxu1 }
 0x121   : > { %v2685_v45 = vpop.f32.mrb[10].mxu1 }
 0x122   : > { %v2687_v63 = vpop.f32.mrb[11].mxu1 }
 0x125   : > { %v2689_v49 = vpop.f32.mrb[12].mxu1 }
 0x126   : > { %v2691_v61 = vpop.f32.mrb[13].mxu1 }
 0x129   : > { %v2693_v9 = vpop.f32.mrb[14].mxu1 }
 0x12a   : > { %v2695_v18 = vpop.f32.mrb[15].mxu1 }
 0x12d   : > { %v2697_v23 = vpop.f32.mrb[16].mxu1 }
 0x12e   : > { %v2699_v0 = vpop.f32.mrb[17].mxu1 }
 0x131   : > { %v2701_v50 = vpop.f32.mrb[18].mxu1 }
 0x132   : > { %v2705_v59 = vpop.f32.mrb[19].mxu1 }
 0x135   : > { %v2707_v2 = vpop.f32.mrb[20].mxu1 }
 0x136   : > { %v2710_v4 = vpop.f32.mrb[21].mxu1 }
 0x139   : > { %v2717_v6 = vpop.f32.mrb[22].mxu1 }
 0x13a   : > { %v2722_v11 = vpop.f32.mrb[23].mxu1 }
 0x13d   : > { %v2726_v15 = vpop.f32.mrb[24].mxu1 }
 0x13e   : > { %v2729_v19 = vpop.f32.mrb[25].mxu1 }
 0x13f   : > { %v925_v8 = vpop.f32.mrb[0].mxu0 }
 0x140   : > { %v2724_v12 = vadd.f32 %v925_v8, %v554_v53  ;;  %v927_v13 = vpop.f32.mrb[1].mxu0 }
 0x141   : > { %v1898_v14 = vadd.f32 %v927_v13, %v556_v54  ;;  %v2733_v7 = vpop.f32.mrb[26].mxu1  ;;  %v1056_v13 = vsub.s32 0, %v2703_v1 }
 0x142   : > { %v2736_v30 = vpop.f32.mrb[27].mxu1 }
 0x143   : > { %v1065_v16 = vadd.f32 %v1898_v14, %v2720_v10  ;;  %v931_v17 = vpop.f32.mrb[2].mxu0 }
 0x144   : > { %v2731_v20 = vadd.f32 %v931_v17, %v560_v55  ;;  %v933_v21 = vpop.f32.mrb[3].mxu0 }
 0x145   : > { %v1662_v22 = vmul.f32 -1.442695, %v1065_v16  ;;  %v1900_v24 = vadd.f32 %v933_v21, %v562_v56  ;;  %v2740_v40 = vpop.f32.mrb[28].mxu1 }
 0x146   : > { %v2743_v43 = vpop.f32.mrb[29].mxu1 }
 0x147   : > { %2002 = vpow2.f32 %v1662_v22  ;;  %v1067_v25 = vadd.f32 %v1900_v24, %v2720_v10  ;;  %v937_v27 = vpop.f32.mrb[4].mxu0 }
 0x148   : > { %v2738_v31 = vadd.f32 %v937_v27, %v566_v57  ;;  %v939_v32 = vpop.f32.mrb[5].mxu0 }
 0x149   : > { %v1663_v33 = vmul.f32 -1.442695, %v1067_v25  ;;  %v1902_v34 = vadd.f32 %v939_v32, %v568_v58  ;;  %v2747_v48 = vpop.f32.mrb[30].mxu1 }
 0x14a   : > { %v2750_v36 = vpop.f32.mrb[31].mxu1 }
 0x14b   : > { %2004 = vpow2.f32 %v1663_v33  ;;  %v1069_v41 = vadd.f32 %v1902_v34, %v2720_v10  ;;  %v943_v42 = vpop.f32.mrb[6].mxu0 }
 0x14c   : > { %v2745_v35 = vadd.f32 %v943_v42, %v572_v38  ;;  %v945_v44 = vpop.f32.mrb[7].mxu0 }
 0x14d   : > { %v1664_v46 = vmul.f32 -1.442695, %v1069_v41  ;;  %v1904_v47 = vadd.f32 %v945_v44, %v574_v60 }
 0x14f   : > { %2006 = vpow2.f32 %v1664_v46  ;;  %v1071_v51 = vadd.f32 %v1904_v47, %v2720_v10  ;;  %v949_v52 = vpop.f32.mrb[8].mxu0 }
 0x150   : > { %v2752_v53 = vadd.f32 %v949_v52, %v578_v62  ;;  %v951_v54 = vpop.f32.mrb[9].mxu0 }
 0x151   : > { %v2003_v55 = vpop.eup %2002  ;;  %v1665_v56 = vmul.f32 -1.442695, %v1071_v51  ;;  %v1906_v57 = vadd.f32 %v951_v54, %v580_v39 }
 0x152   : > { %v1144_v58 = vadd.f32 1.0, %v2003_v55 }
 0x153   : > { %2008 = vpow2.f32 %v1665_v56  ;;  %v1073_v38 = vadd.f32 %v1906_v57, %v2720_v10  ;;  %v955_v37 = vpop.f32.mrb[10].mxu0 }
 0x154   : > { %2010 = vrcp.f32 %v1144_v58  ;;  %v2756_v60 = vadd.f32 %v955_v37, %v2685_v45  ;;  %v957_v3 = vpop.f32.mrb[11].mxu0  ;;  %v2765_v45 = vrot.slane %v2715_v5, %v1056_v13 }
 0x155   : > { %v2005_v8 = vpop.eup %2004  ;;  %v1666_v14 = vmul.f32 -1.442695, %v1073_v38  ;;  %v1908_v62 = vadd.f32 %v957_v3, %v2687_v63 }
 0x156   : > { %v1145_v16 = vadd.f32 1.0, %v2005_v8  ;;  %v1064_v41 = vadd.f32 %v2724_v12, %v2765_v45 }
 0x157   : > { %2012 = vpow2.f32 %v1666_v14  ;;  %v1075_v39 = vadd.f32 %v1908_v62, %v2720_v10  ;;  %v961_v17 = vpop.f32.mrb[12].mxu0 }
 0x158   : > { %2014 = vrcp.f32 %v1145_v16  ;;  %v2762_v21 = vadd.f32 %v961_v17, %v2689_v49  ;;  %v963_v22 = vpop.f32.mrb[13].mxu0 }
 0x159   : > { %v2007_v24 = vpop.eup %2006  ;;  %v1667_v25 = vmul.f32 -1.442695, %v1075_v39  ;;  %v1910_v1 = vadd.f32 %v963_v22, %v2691_v61 }
 0x15a   : > { %v1146_v27 = vadd.f32 1.0, %v2007_v24 }
 0x15b   : > { %2016 = vpow2.f32 %v1667_v25  ;;  %v1077_v63 = vadd.f32 %v1910_v1, %v2720_v10  ;;  %v967_v32 = vpop.f32.mrb[14].mxu0 }
 0x15c   : > { %2018 = vrcp.f32 %v1146_v27  ;;  %v2770_v33 = vadd.f32 %v967_v32, %v2693_v9  ;;  %v969_v49 = vpop.f32.mrb[15].mxu0 }
 0x15d   : > { %v2009_v34 = vpop.eup %2008  ;;  %v1668_v5 = vmul.f32 -1.442695, %v1077_v63  ;;  %v1912_v42 = vadd.f32 %v969_v49, %v2695_v18  ;;  %v1066_v18 = vadd.f32 %v2731_v20, %v2765_v45 }
 0x15e   : > { %v2011_v44 = vpop.eup %2010  ;;  %v1147_v61 = vadd.f32 1.0, %v2009_v34 }
 0x15f   : > { %2020 = vpow2.f32 %v1668_v5  ;;  %v1079_v46 = vadd.f32 %v1912_v42, %v2720_v10  ;;  %v973_v47 = vpop.f32.mrb[16].mxu0  ;;  %v1192_v51 = vmul.f32 %v2011_v44, %v1064_v41  ;;  %v2066_v42 = vld [vmem:[#allocation2 + $0x20] sm:$0xff] }
 0x160   : > { %2022 = vrcp.f32 %v1147_v61  ;;  %v2783_v9 = vadd.f32 %v973_v47, %v2697_v23  ;;  %v975_v12 = vpop.f32.mrb[17].mxu0 }
 0x161   : > { %v2013_v52 = vpop.eup %2012  ;;  %v1669_v54 = vmul.f32 -1.442695, %v1079_v46  ;;  %v1914_v55 = vadd.f32 %v975_v12, %v2699_v0  ;;  %1745 = vmatprep.mubr.f32.mxu1 %v1192_v51  ;;  %v1376_v56 = vadd.f32 %v1192_v51, %v2267_v26  ;;  %v1068_v0 = vadd.f32 %v2738_v31, %v2765_v45 }
 0x162   : > { %v2015_v57 = vpop.eup %2014  ;;  %v1148_v58 = vadd.f32 1.0, %v2013_v52 }
 0x163   : > { %2024 = vpow2.f32 %v1669_v54  ;;  %v1081_v38 = vadd.f32 %v1914_v55, %v2720_v10  ;;  %1392 = vst [vmem:[%s2780_s15] sm:$0xff] %v1376_v56  ;;  %v979_v23 = vpop.f32.mrb[18].mxu0  ;;  %v1193_v37 = vmul.f32 %v2015_v57, %v1066_v18  ;;  %v2067_v55 = vld [vmem:[#allocation2 + $0x28] sm:$0xff] }
 0x164   : > { %2026 = vrcp.f32 %v1148_v58  ;;  %v2792_v3 = vadd.f32 %v979_v23, %v2701_v50  ;;  %v981_v20 = vpop.f32.mrb[19].mxu0 }
 0x165   : > { %v2017_v8 = vpop.eup %2016  ;;  %v1670_v13 = vmul.f32 -1.442695, %v1081_v38  ;;  %v1916_v26 = vadd.f32 %v981_v20, %v2705_v59  ;;  %1746 = vmatmul.mubr.f32.vlgmr.msra.gmra.mrb[32].mxu1 %v1193_v37  ;;  %v1377_v14 = vadd.f32 %v1193_v37, %v2271_v28  ;;  %v1070_v59 = vadd.f32 %v2745_v35, %v2765_v45 }
 0x166   : > { %v2019_v62 = vpop.eup %2018  ;;  %v1149_v16 = vadd.f32 1.0, %v2017_v8 }
 0x167   : > { %2028 = vpow2.f32 %v1670_v13  ;;  %v1083_v39 = vadd.f32 %v1916_v26, %v2720_v10  ;;  %1393 = vst [vmem:[%s2780_s15 + $0x8] sm:$0xff] %v1377_v14  ;;  %v985_v50 = vpop.f32.mrb[20].mxu0  ;;  %v1194_v17 = vmul.f32 %v2019_v62, %v1068_v0  ;;  %v2068_v13 = vld [vmem:[#allocation2 + $0x30] sm:$0xff] }
 0x168   : > { %2030 = vrcp.f32 %v1149_v16  ;;  %v2801_v22 = vadd.f32 %v985_v50, %v2707_v2  ;;  %v987_v31 = vpop.f32.mrb[21].mxu0 }
 0x169   : > { %v2021_v24 = vpop.eup %2020  ;;  %v1671_v25 = vmul.f32 -1.442695, %v1083_v39  ;;  %v1918_v28 = vadd.f32 %v987_v31, %v2710_v4  ;;  %1748 = vmatprep.mubr.f32.mxu1 %v1194_v17  ;;  %v1378_v1 = vadd.f32 %v1194_v17, %v2274_v29  ;;  %v1072_v4 = vadd.f32 %v2752_v53, %v2765_v45 }
 0x16a   : > { %v2023_v27 = vpop.eup %2022  ;;  %v1150_v63 = vadd.f32 1.0, %v2021_v24 }
 0x16b   : > { %2032 = vpow2.f32 %v1671_v25  ;;  %v1085_v32 = vadd.f32 %v1918_v28, %v2720_v10  ;;  %1394 = vst [vmem:[%s2780_s15 + $0x10] sm:$0xff] %v1378_v1  ;;  %v991_v49 = vpop.f32.mrb[22].mxu0  ;;  %v1195_v2 = vmul.f32 %v2023_v27, %v1070_v59  ;;  %v2069_v59 = vld [vmem:[#allocation2 + $0x38] sm:$0xff] }
 0x16c   : > { %2034 = vrcp.f32 %v1150_v63  ;;  %v2810_v34 = vadd.f32 %v991_v49, %v2717_v6  ;;  %v993_v35 = vpop.f32.mrb[23].mxu0 }
 0x16d   : > { %v2025_v41 = vpop.eup %2024  ;;  %v1672_v5 = vmul.f32 -1.442695, %v1085_v32  ;;  %v1920_v29 = vadd.f32 %v993_v35, %v2722_v11  ;;  %1749 = vmatmul.mubr.f32.gmra.mrb[34].mxu1 %v1195_v2  ;;  %v1379_v44 = vadd.f32 %v2066_v42, %v1195_v2  ;;  %v1074_v11 = vadd.f32 %v2756_v60, %v2765_v45 }
 0x16e   : > { %v2027_v61 = vpop.eup %2026  ;;  %v1151_v46 = vadd.f32 1.0, %v2025_v41  ;;  %v2070_v41 = vld [vmem:[#allocation2 + $0x40] sm:$0xff] }
 0x16f   : > { %2036 = vpow2.f32 %v1672_v5  ;;  %v1087_v47 = vadd.f32 %v1920_v29, %v2720_v10  ;;  %1395 = vst [vmem:[%s2780_s15 + $0x18] sm:$0xff] %v1379_v44  ;;  %v997_v51 = vpop.f32.mrb[24].mxu0  ;;  %v1196_v6 = vmul.f32 %v2027_v61, %v1072_v4  ;;  %v1082_v61 = vadd.f32 %v2792_v3, %v2765_v45 }
 0x170   : > { %2038 = vrcp.f32 %v1151_v46  ;;  %v2818_v12 = vadd.f32 %v997_v51, %v2726_v15  ;;  %v999_v53 = vpop.f32.mrb[25].mxu0 }
 0x171   : > { %v2029_v52 = vpop.eup %2028  ;;  %v1673_v18 = vmul.f32 -1.442695, %v1087_v47  ;;  %v1922_v54 = vadd.f32 %v999_v53, %v2729_v19  ;;  %1751 = vmatprep.mubr.f32.mxu1 %v1196_v6  ;;  %v1380_v56 = vadd.f32 %v2067_v55, %v1196_v6  ;;  %v1076_v19 = vadd.f32 %v2762_v21, %v2765_v45 }
 0x172   : > { %v2031_v57 = vpop.eup %2030  ;;  %v1152_v58 = vadd.f32 1.0, %v2029_v52  ;;  %v2072_v52 = vld [vmem:[#allocation2 + $0x50] sm:$0xff] }
 0x173   : > { %2040 = vpow2.f32 %v1673_v18  ;;  %v1089_v38 = vadd.f32 %v1922_v54, %v2720_v10  ;;  %1396 = vst [vmem:[%s2780_s15 + $0x20] sm:$0xff] %v1380_v56  ;;  %v1003_v23 = vpop.f32.mrb[26].mxu0  ;;  %v1197_v15 = vmul.f32 %v2031_v57, %v1074_v11  ;;  %v1086_v56 = vadd.f32 %v2810_v34, %v2765_v45  ;;  %v2073_v57 = vld [vmem:[#allocation2 + $0x58] sm:$0xff] }
 0x174   : > { %2042 = vrcp.f32 %v1152_v58  ;;  %v2826_v37 = vadd.f32 %v1003_v23, %v2733_v7  ;;  %v1005_v60 = vpop.f32.mrb[27].mxu0 }
 0x175   : > { %v2033_v20 = vpop.eup %2032  ;;  %v1674_v8 = vmul.f32 -1.442695, %v1089_v38  ;;  %v1924_v0 = vadd.f32 %v1005_v60, %v2736_v30  ;;  %1752 = vmatmul.mubr.f32.gmra.mrb[36].mxu1 %v1197_v15  ;;  %v1381_v26 = vadd.f32 %v2068_v13, %v1197_v15  ;;  %v1078_v30 = vadd.f32 %v2770_v33, %v2765_v45 }
 0x176   : > { %v2035_v14 = vpop.eup %2034  ;;  %v1153_v62 = vadd.f32 1.0, %v2033_v20  ;;  %v1088_v60 = vadd.f32 %v2818_v12, %v2765_v45  ;;  %v2074_v20 = vld [vmem:[#allocation2 + $0x60] sm:$0xff]  ;;  %v1090_v13 = vadd.f32 %v2826_v37, %v2765_v45 }
 0x177   : > { %2044 = vpow2.f32 %v1674_v8  ;;  %v1091_v16 = vadd.f32 %v1924_v0, %v2720_v10  ;;  %1397 = vst [vmem:[%s2780_s15 + $0x28] sm:$0xff] %v1381_v26  ;;  %v1009_v39 = vpop.f32.mrb[28].mxu0  ;;  %v1198_v7 = vmul.f32 %v2035_v14, %v1076_v19  ;;  %v2075_v26 = vld [vmem:[#allocation2 + $0x68] sm:$0xff] }
 0x178   : > { %2046 = vrcp.f32 %v1153_v62  ;;  %v2834_v50 = vadd.f32 %v1009_v39, %v2740_v40  ;;  %v1011_v21 = vpop.f32.mrb[29].mxu0  ;;  %v2076_v39 = vld [vmem:[#allocation2 + $0x70] sm:$0xff] }
 0x179   : > { %v2037_v17 = vpop.eup %2036  ;;  %v1675_v31 = vmul.f32 -1.442695, %v1091_v16  ;;  %v1926_v24 = vadd.f32 %v1011_v21, %v2743_v43  ;;  %1754 = vmatprep.mubr.f32.mxu1 %v1198_v7  ;;  %v1382_v25 = vadd.f32 %v2069_v59, %v1198_v7  ;;  %v1080_v43 = vadd.f32 %v2783_v9, %v2765_v45 }
 0x17a   : > { %v2039_v28 = vpop.eup %2038  ;;  %v1154_v1 = vadd.f32 1.0, %v2037_v17  ;;  %v1092_v12 = vadd.f32 %v2834_v50, %v2765_v45 }
 0x17b   : > { %2048 = vpow2.f32 %v1675_v31  ;;  %v1093_v27 = vadd.f32 %v1926_v24, %v2720_v10  ;;  %1398 = vst [vmem:[%s2780_s15 + $0x30] sm:$0xff] %v1382_v25  ;;  %v1015_v63 = vpop.f32.mrb[30].mxu0  ;;  %v1199_v40 = vmul.f32 %v2039_v28, %v1078_v30  ;;  %v2077_v30 = vld [vmem:[#allocation2 + $0x78] sm:$0xff]  ;;  %v2078_v25 = vld [vmem:[#allocation2 + $0x80] sm:$0xff] }
 0x17c   : > { %2050 = vrcp.f32 %v1154_v1  ;;  %v2842_v32 = vadd.f32 %v1015_v63, %v2747_v48  ;;  %v1017_v33 = vpop.f32.mrb[31].mxu0  ;;  %v1678_v28 = vld [vmem:[%s2916_s5] ss:$0 sm:$0xff] }
 0x17d   : > { %v2041_v49 = vpop.eup %2040  ;;  %v1676_v2 = vmul.f32 -1.442695, %v1093_v27  ;;  %v1928_v35 = vadd.f32 %v1017_v33, %v2750_v36  ;;  %1755 = vmatmul.mubr.f32.gmra.mrb[38].mxu1 %v1199_v40  ;;  %v1383_v4 = vadd.f32 %v2070_v41, %v1199_v40  ;;  %v2071_v36 = vld [vmem:[#allocation2 + $0x48] sm:$0xff] }
 0x17e   : > { %v2043_v5 = vpop.eup %2042  ;;  %v1155_v29 = vadd.f32 1.0, %v2041_v49  ;;  %v1094_v37 = vadd.f32 %v2842_v32, %v2765_v45 }
 0x17f   : > { %2052 = vpow2.f32 %v1676_v2  ;;  %v1095_v42 = vadd.f32 %v1928_v35, %v2720_v10  ;;  %1399 = vst [vmem:[%s2780_s15 + $0x38] sm:$0xff] %v1383_v4  ;;  %v1200_v48 = vmul.f32 %v2043_v5, %v1080_v43  ;;  %v1084_v10 = vadd.f32 %v2801_v22, %v2765_v45 }
 0x180   : > { %2054 = vrcp.f32 %v1155_v29 }
 0x181   : > { %v2045_v44 = vpop.eup %2044  ;;  %v1677_v9 = vmul.f32 -1.442695, %v1095_v42  ;;  %1757 = vmatprep.mubr.f32.mxu1 %v1200_v48  ;;  %v1384_v46 = vadd.f32 %v2071_v36, %v1200_v48 }
 0x182   : > { %v2047_v47 = vpop.eup %2046  ;;  %v1156_v51 = vadd.f32 1.0, %v2045_v44 }
 0x183   : > { %2056 = vpow2.f32 %v1677_v9  ;;  %1400 = vst [vmem:[%s2780_s15 + $0x40] sm:$0xff] %v1384_v46  ;;  %v1201_v6 = vmul.f32 %v2047_v47, %v1082_v61 }
 0x184   : > { %2058 = vrcp.f32 %v1156_v51 }
 0x185   : > { %v2049_v53 = vpop.eup %2048  ;;  %1758 = vmatmul.mubr.f32.gmra.mrb[40].mxu1 %v1201_v6  ;;  %v1385_v11 = vadd.f32 %v2072_v52, %v1201_v6 }
 0x186   : > { %v2051_v3 = vpop.eup %2050  ;;  %v1157_v18 = vadd.f32 1.0, %v2049_v53 }
 0x187   : > { %1401 = vst [vmem:[%s2780_s15 + $0x48] sm:$0xff] %v1385_v11  ;;  %v1202_v54 = vmul.f32 %v2051_v3, %v1084_v10 }
 0x188   : > { %2060 = vrcp.f32 %v1157_v18 }
 0x189   : > { %v2053_v55 = vpop.eup %2052  ;;  %1760 = vmatprep.mubr.f32.mxu1 %v1202_v54  ;;  %v1386_v58 = vadd.f32 %v2073_v57, %v1202_v54 }
 0x18a   : > { %v2055_v38 = vpop.eup %2054  ;;  %v1158_v23 = vadd.f32 1.0, %v2053_v55 }
 0x18b   : > { %1402 = vst [vmem:[%s2780_s15 + $0x50] sm:$0xff] %v1386_v58  ;;  %v1203_v22 = vmul.f32 %v2055_v38, %v1086_v56 }
 0x18c   : > { %2062 = vrcp.f32 %v1158_v23 }
 0x18d   : > { %v2057_v15 = vpop.eup %2056  ;;  %1761 = vmatmul.mubr.f32.gmra.mrb[42].mxu1 %v1203_v22  ;;  %v1387_v19 = vadd.f32 %v2074_v20, %v1203_v22 }
 0x18e   : > { %v2059_v8 = vpop.eup %2058  ;;  %v1159_v0 = vadd.f32 1.0, %v2057_v15 }
 0x18f   : > { %1403 = vst [vmem:[%s2780_s15 + $0x58] sm:$0xff] %v1387_v19  ;;  %v1204_v34 = vmul.f32 %v2059_v8, %v1088_v60 }
 0x190   : > { %2064 = vrcp.f32 %v1159_v0 }
 0x191   : > { %1763 = vmatprep.mubr.f32.mxu1 %v1204_v34  ;;  %v1388_v14 = vadd.f32 %v2075_v26, %v1204_v34 }
 0x192   : > { %v2061_v62 = vpop.eup %2060 }
 0x193   : > { %1404 = vst [vmem:[%s2780_s15 + $0x60] sm:$0xff] %v1388_v14  ;;  %v1205_v16 = vmul.f32 %v2061_v62, %v1090_v13 }
 0x195   : > { %1764 = vmatmul.mubr.f32.gmra.mrb[44].mxu1 %v1205_v16  ;;  %v1389_v7 = vadd.f32 %v2076_v39, %v1205_v16 }
 0x196   : > { %v2063_v21 = vpop.eup %2062 }
 0x197   : > { %1405 = vst [vmem:[%s2780_s15 + $0x68] sm:$0xff] %v1389_v7  ;;  %v1206_v17 = vmul.f32 %v2063_v21, %v1092_v12 }
 0x199   : > { %1766 = vmatprep.mubr.f32.mxu1 %v1206_v17  ;;  %v1390_v31 = vadd.f32 %v2077_v30, %v1206_v17 }
 0x19a   : > { %v2065_v24 = vpop.eup %2064 }
 0x19b   : > { %1406 = vst [vmem:[%s2780_s15 + $0x70] sm:$0xff] %v1390_v31  ;;  %v1207_v59 = vmul.f32 %v2065_v24, %v1094_v37 }
 0x19d   : > { %1767 = vmatmul.mubr.f32.gmra.mrb[46].mxu1 %v1207_v59  ;;  %v1391_v50 = vadd.f32 %v2078_v25, %v1207_v59 }
 0x19f   : > { %1407 = vst [vmem:[%s2780_s15 + $0x78] sm:$0xff] %v1391_v50 }
 0x238   : > { %v1747_v45 = vpop.f32.mrb[32].mxu1 }
 0x239   : > { %v1303_v1 = vadd.f32 %v1747_v45, %v1678_v28  ;;  %v1297_v27 = vpop.f32.mrb[33].mxu1 }
 0x23a   : > { %v1298_v63 = vadd.f32 %v1678_v28, %v1297_v27 }
 0x23b   : > { %1409 = vst [vmem:[%s2878_s20 + $0x8] sm:$0xff] %v1303_v1 }
 0x23c   : > { %1408 = vst [vmem:[%s2878_s20] sm:$0xff] %v1298_v63 }
 0x240   : > { %v1750_v40 = vpop.f32.mrb[34].mxu1 }
 0x241   : > { %v1313_v32 = vadd.f32 %v1750_v40, %v1678_v28  ;;  %v1307_v33 = vpop.f32.mrb[35].mxu1 }
 0x242   : > { %v1308_v49 = vadd.f32 %v1678_v28, %v1307_v33 }
 0x243   : > { %1411 = vst [vmem:[%s2878_s20 + $0x18] sm:$0xff] %v1313_v32 }
 0x244   : > { %1410 = vst [vmem:[%s2878_s20 + $0x10] sm:$0xff] %v1308_v49 }
 0x248   : > { %v1753_v43 = vpop.f32.mrb[36].mxu1 }
 0x249   : > { %v1323_v2 = vadd.f32 %v1753_v43, %v1678_v28  ;;  %v1317_v35 = vpop.f32.mrb[37].mxu1 }
 0x24a   : > { %v1318_v41 = vadd.f32 %v1678_v28, %v1317_v35 }
 0x24b   : > { %1413 = vst [vmem:[%s2878_s20 + $0x28] sm:$0xff] %v1323_v2 }
 0x24c   : > { %1412 = vst [vmem:[%s2878_s20 + $0x20] sm:$0xff] %v1318_v41 }
 0x250   : > { %v1756_v4 = vpop.f32.mrb[38].mxu1 }
 0x251   : > { %v1333_v5 = vadd.f32 %v1756_v4, %v1678_v28  ;;  %v1327_v29 = vpop.f32.mrb[39].mxu1 }
 0x252   : > { %v1328_v42 = vadd.f32 %v1678_v28, %v1327_v29 }
 0x253   : > { %1415 = vst [vmem:[%s2878_s20 + $0x38] sm:$0xff] %v1333_v5 }
 0x254   : > { %1414 = vst [vmem:[%s2878_s20 + $0x30] sm:$0xff] %v1328_v42 }
 0x258   : > { %v1759_v48 = vpop.f32.mrb[40].mxu1 }
 0x259   : > { %v1343_v44 = vadd.f32 %v1759_v48, %v1678_v28  ;;  %v1337_v61 = vpop.f32.mrb[41].mxu1 }
 0x25a   : > { %v1338_v9 = vadd.f32 %v1678_v28, %v1337_v61 }
 0x25b   : > { %1417 = vst [vmem:[%s2878_s20 + $0x48] sm:$0xff] %v1343_v44 }
 0x25c   : > { %1416 = vst [vmem:[%s2878_s20 + $0x40] sm:$0xff] %v1338_v9 }
 0x260   : > { %v1762_v36 = vpop.f32.mrb[42].mxu1 }
 0x261   : > { %v1353_v46 = vadd.f32 %v1762_v36, %v1678_v28  ;;  %v1347_v47 = vpop.f32.mrb[43].mxu1 }
 0x262   : > { %v1348_v51 = vadd.f32 %v1678_v28, %v1347_v47 }
 0x263   : > { %1419 = vst [vmem:[%s2878_s20 + $0x58] sm:$0xff] %v1353_v46 }
 0x264   : > { %1418 = vst [vmem:[%s2878_s20 + $0x50] sm:$0xff] %v1348_v51 }
 0x268   : > { %v1765_v6 = vpop.f32.mrb[44].mxu1 }
 0x269   : > { %v1363_v53 = vadd.f32 %v1765_v6, %v1678_v28  ;;  %v1357_v10 = vpop.f32.mrb[45].mxu1 }
 0x26a   : > { %v1358_v52 = vadd.f32 %v1678_v28, %v1357_v10 }
 0x26b   : > { %1421 = vst [vmem:[%s2878_s20 + $0x68] sm:$0xff] %v1363_v53 }
 0x26c   : > { %1420 = vst [vmem:[%s2878_s20 + $0x60] sm:$0xff] %v1358_v52 }
 0x270   : > { %v1768_v11 = vpop.f32.mrb[46].mxu1 }
 0x271   : > { %v1373_v3 = vadd.f32 %v1768_v11, %v1678_v28  ;;  %v1367_v18 = vpop.f32.mrb[47].mxu1 }
 0x272   : > { %v1368_v54 = vadd.f32 %v1678_v28, %v1367_v18 }
 0x273   : > { %1423 = vst [vmem:[%s2878_s20 + $0x78] sm:$0xff] %v1373_v3 }
 0x274   : > { %1422 = vst [vmem:[%s2878_s20 + $0x70] sm:$0xff] %v1368_v54 }
 0x275 PF: > { %s18_s28 = sadd.s32 1, %s2117_s28   ;;  %s2919_s24 = smov %s2109_s26 }
 0x276   : > { %p15_p8 = scmp.ge.s32.totalorder %s18_s28, 6   ;;  %s2920_s25 = smov %s2113_s27 }
 0x277   : > { %s2921_s26 = smov %s2924_s29  ;;  %s2922_s27 = smov %s2928_s30 }
 0x278   :  { %17 = sbr.rel (!%p15_p8) target bundleno = 3 (0x3), region = 91 }

</bundles_post_ra>
